<compile_context>
chip_gen: v7x
topology: tpu7x:2x2x1
jax: 0.10.0
libtpu: 0.0.40
codegen_flags: <defaults>
</compile_context>

<pallas_src>
import functools

import jax
import jax.numpy as jnp
from jax import lax
from jax.experimental import pallas as pl
from jax.experimental.pallas import tpu as pltpu

H_PAD = 128      # hidden dim padded to a full lane width
K_PAD = 128      # class dim padded to a full lane width (lane-dense stores)
NEG_INF = -1e30  # finite "minus infinity" for masking padded class columns


# ------------------------------ kernel bodies -------------------------------
def _mlp_logits(feat_ref, w1_ref, b1_ref, w2_ref, b2_ref):
    """(tile_n, C_in) f32 -> (tile_n, K_PAD) f32 logits (padded classes == 0)."""
    x = feat_ref[...].astype(jnp.bfloat16)            # bf16 cast folded into kernel
    h = jnp.dot(x, w1_ref[...], preferred_element_type=jnp.float32)
    h = jnp.maximum(h + b1_ref[...], 0.0)             # bias/ReLU in f32
    logits = jnp.dot(h.astype(jnp.bfloat16), w2_ref[...],
                     preferred_element_type=jnp.float32)
    return logits + b2_ref[...]


def _ce_partial(logits, labels, *, num_classes, n_total, tile_n):
    """Per-tile CE partial sums as a lane-dense (1, 8, 128) block.

    [0, 0, 0] = sum of nll over valid points in this tile, [0, 0, 1] = count.
    The final mean is reduced in JAX (keeps every grid axis 'parallel').
    """
    i = pl.program_id(0)
    col = lax.broadcasted_iota(jnp.int32, logits.shape, 1)
    class_ok = col < num_classes
    masked = jnp.where(class_ok, logits, NEG_INF)
    m = jnp.max(masked, axis=-1, keepdims=True)
    p = jnp.where(class_ok, jnp.exp(masked - m), 0.0)
    lse = m + jnp.log(jnp.sum(p, axis=-1, keepdims=True))
    tgt = jnp.sum(jnp.where(col == labels, logits, 0.0), axis=-1, keepdims=True)
    nll = lse - tgt                                    # (tile_n, 1)

    # mask ignore_index == -1 AND the ragged rows of the last tile
    row = i * tile_n + lax.broadcasted_iota(jnp.int32, (tile_n, 1), 0)
    valid = jnp.logical_and(labels >= 0, row < n_total)
    sum_nll = jnp.sum(jnp.where(valid, nll, 0.0))
    count = jnp.sum(valid.astype(jnp.float32))

    sub = lax.broadcasted_iota(jnp.int32, (1, 8, K_PAD), 1)
    lane = lax.broadcasted_iota(jnp.int32, (1, 8, K_PAD), 2)
    return jnp.where((sub == 0) & (lane == 0), sum_nll,
                     jnp.where((sub == 0) & (lane == 1), count, 0.0))


def _logits_kernel(feat_ref, w1_ref, b1_ref, w2_ref, b2_ref, logits_ref):
    logits = _mlp_logits(feat_ref, w1_ref, b1_ref, w2_ref, b2_ref)
    logits_ref[...] = logits.astype(logits_ref.dtype)          # bf16 store


def _loss_kernel(feat_ref, w1_ref, b1_ref, w2_ref, b2_ref, labels_ref,
                 partial_ref, *, num_classes, n_total):
    logits = _mlp_logits(feat_ref, w1_ref, b1_ref, w2_ref, b2_ref)
    tile_n = labels_ref.shape[0]
    partial_ref[...] = _ce_partial(logits, labels_ref[...],
                                   num_classes=num_classes,
                                   n_total=n_total, tile_n=tile_n)


def _fused_kernel(feat_ref, w1_ref, b1_ref, w2_ref, b2_ref, labels_ref,
                  logits_ref, partial_ref, *, num_classes, n_total):
    logits = _mlp_logits(feat_ref, w1_ref, b1_ref, w2_ref, b2_ref)
    logits_ref[...] = logits.astype(logits_ref.dtype)          # bf16 store
    tile_n = labels_ref.shape[0]
    partial_ref[...] = _ce_partial(logits, labels_ref[...],
                                   num_classes=num_classes,
                                   n_total=n_total, tile_n=tile_n)


# ------------------------------ host-side helpers ----------------------------
def _pad_params(params):
    """Cast weights to bf16 and zero-pad hidden/class dims to 128 (tiny, once)."""
    w1 = params["w1"].astype(jnp.bfloat16)
    b1 = params["b1"].astype(jnp.float32)
    w2 = params["w2"].astype(jnp.bfloat16)
    b2 = params["b2"].astype(jnp.float32)
    c_in, hidden = w1.shape
    num_classes = w2.shape[1]
    assert hidden <= H_PAD and num_classes <= K_PAD
    w1p = jnp.pad(w1, ((0, 0), (0, H_PAD - hidden)))
    b1p = jnp.pad(b1, ((0, 0), (0, H_PAD - hidden)))
    w2p = jnp.pad(w2, ((0, H_PAD - hidden), (0, K_PAD - num_classes)))
    b2p = jnp.pad(b2, ((0, 0), (0, K_PAD - num_classes)))
    return w1p, b1p, w2p, b2p, num_classes


def _specs(tile_n, c_in):
    feat_spec = pl.BlockSpec((tile_n, c_in), lambda i: (i, 0))
    weight_specs = [
        pl.BlockSpec((c_in, H_PAD), lambda i: (0, 0)),   # w1 (VMEM-resident)
        pl.BlockSpec((1, H_PAD), lambda i: (0, 0)),      # b1
        pl.BlockSpec((H_PAD, K_PAD), lambda i: (0, 0)),  # w2
        pl.BlockSpec((1, K_PAD), lambda i: (0, 0)),      # b2
    ]
    logits_spec = pl.BlockSpec((tile_n, K_PAD), lambda i: (i, 0))
    label_spec = pl.BlockSpec((tile_n, 1), lambda i: (i, 0))
    partial_spec = pl.BlockSpec((1, 8, K_PAD), lambda i: (i, 0, 0))
    return feat_spec, weight_specs, logits_spec, label_spec, partial_spec


def _vmem_limit_bytes(tile_n, c_in):
    tiled = tile_n * c_in * 4 + tile_n * K_PAD * 2 + tile_n * 4 + 8 * K_PAD * 4
    resident = c_in * H_PAD * 2 + H_PAD * 4 + H_PAD * K_PAD * 2 + K_PAD * 4
    live = tile_n * H_PAD * 4 + 3 * tile_n * K_PAD * 4      # h + CE temporaries
    est = 2 * tiled + 2 * resident + live
    try:  # generation-aware cap: never request more than 3/4 of physical VMEM
        info = pltpu.get_tpu_info()
        cap = int(getattr(info, "vmem_capacity_bytes", 64 * 1024 * 1024)) * 3 // 4
    except Exception:
        cap = 48 * 1024 * 1024                              # safe on v5e/v6e/v7x
    return int(min(max(2 * est, 8 * 1024 * 1024), cap))


def _reduce_loss(partials):
    total = jnp.sum(partials[:, 0, 0])
    count = jnp.sum(partials[:, 0, 1])
    # NOTE: torch CE(reduction='mean') returns NaN when every label is ignored;
    # we return 0.0 in that degenerate case (intentional).
    return total / jnp.maximum(count, 1.0)


# ------------------------------ forward wrappers -----------------------------
def forward_with_loss(feat, segment, params, *, tile_n=2048, return_logits=True):
    w1p, b1p, w2p, b2p, num_classes = _pad_params(params)
    n, c_in = feat.shape
    n_tiles = pl.cdiv(n, tile_n)
    seg = segment.reshape(-1, 1).astype(jnp.int32)
    feat_f32 = feat.astype(jnp.float32)

    feat_spec, weight_specs, logits_spec, label_spec, partial_spec = _specs(tile_n, c_in)
    cp = pltpu.CompilerParams(
        dimension_semantics=("parallel",),                   # megacore-safe on v7x
        vmem_limit_bytes=_vmem_limit_bytes(tile_n, c_in))

    if return_logits:
        kernel = functools.partial(_fused_kernel, num_classes=num_classes, n_total=n)
        logits_bf16, partials = pl.pallas_call(
            kernel,
            out_shape=(jax.ShapeDtypeStruct((n, K_PAD), jnp.bfloat16),
                       jax.ShapeDtypeStruct((n_tiles, 8, K_PAD), jnp.float32)),
            grid=(n_tiles,),
            in_specs=[feat_spec] + weight_specs + [label_spec],
            out_specs=(logits_spec, partial_spec),
            compiler_params=cp,
        )(feat_f32, w1p, b1p, w2p, b2p, seg)
        loss = _reduce_loss(partials)
        # TODO(synk): consumers that accept the padded (N, 128) bf16 layout can
        # skip this slice/cast pass entirely.
        seg_logits = logits_bf16[:, :num_classes].astype(jnp.float32)
        return seg_logits, loss

    # training path: loss only, no logits writeback at all
    kernel = functools.partial(_loss_kernel, num_classes=num_classes, n_total=n)
    partials = pl.pallas_call(
        kernel,
        out_shape=jax.ShapeDtypeStruct((n_tiles, 8, K_PAD), jnp.float32),
        grid=(n_tiles,),
        in_specs=[feat_spec] + weight_specs + [label_spec],
        out_specs=partial_spec,
        compiler_params=cp,
    )(feat_f32, w1p, b1p, w2p, b2p, seg)
    return None, _reduce_loss(partials)


def forward_logits(feat, params, *, tile_n=2048):
    w1p, b1p, w2p, b2p, num_classes = _pad_params(params)
    n, c_in = feat.shape
    n_tiles = pl.cdiv(n, tile_n)
    feat_spec, weight_specs, logits_spec, _, _ = _specs(tile_n, c_in)

    logits_bf16 = pl.pallas_call(
        _logits_kernel,
        out_shape=jax.ShapeDtypeStruct((n, K_PAD), jnp.bfloat16),
        grid=(n_tiles,),
        in_specs=[feat_spec] + weight_specs,
        out_specs=logits_spec,
        compiler_params=pltpu.CompilerParams(
            dimension_semantics=("parallel",),
            vmem_limit_bytes=_vmem_limit_bytes(tile_n, c_in)),
    )(feat.astype(jnp.float32), w1p, b1p, w2p, b2p)
    return logits_bf16[:, :num_classes].astype(jnp.float32)


# ------------------------------ segmentor wrapper ----------------------------
class DefaultSegmentor:
    def __init__(self, params, training=False, tile_n=2048):
        self.params = params
        self.training = training
        self.tile_n = tile_n

    def forward(self, input_dict):
        input_dict = dict(input_dict)
        if "condition" in input_dict:
            # torch: input_dict['condition'] = input_dict['condition'][0]
            input_dict["condition"] = input_dict["condition"][0]

        if self.training:
            _, loss = forward_with_loss(input_dict["feat"], input_dict["segment"],
                                        self.params, tile_n=self.tile_n,
                                        return_logits=False)
            return dict(loss=loss)
        elif "segment" in input_dict:
            seg_logits, loss = forward_with_loss(input_dict["feat"],
                                                 input_dict["segment"],
                                                 self.params, tile_n=self.tile_n,
                                                 return_logits=True)
            return dict(loss=loss, seg_logits=seg_logits)
        else:
            seg_logits = forward_logits(input_dict["feat"], self.params,
                                        tile_n=self.tile_n)
            return dict(seg_logits=seg_logits)


# --------------------------------- reference ---------------------------------
def _reference(feat, params, segment, num_classes):
    f = feat.astype(jnp.bfloat16).astype(jnp.float32)
    w1 = params["w1"].astype(jnp.bfloat16).astype(jnp.float32)
    w2 = params["w2"].astype(jnp.bfloat16).astype(jnp.float32)
    h = jnp.maximum(f @ w1 + params["b1"], 0.0)
    h = h.astype(jnp.bfloat16).astype(jnp.float32)
    logits = h @ w2 + params["b2"]
    logp = jax.nn.log_softmax(logits, axis=-1)
    labels = segment.reshape(-1)
    valid = labels >= 0
    safe = jnp.clip(labels, 0, num_classes - 1)
    nll = -jnp.take_along_axis(logp, safe[:, None], axis=-1)[:, 0]
    loss = jnp.sum(jnp.where(valid, nll, 0.0)) / jnp.maximum(jnp.sum(valid), 1)
    return logits, loss


# ----------------------------------- main -------------------------------------
if __name__ == "__main__":
    # small demo shapes: 1000 points with TILE_N=256 (4-tile grid, ragged last
    # tile exercises the in-kernel masking), C_in=16, hidden=32, 13 classes.
    N_POINTS, C_IN, HIDDEN, N_CLS = 1000, 16, 32, 13
    TILE_N = 256

    key = jax.random.PRNGKey(0)
    k_feat, k_w1, k_w2, k_seg = jax.random.split(key, 4)

    params = dict(
        w1=jax.random.normal(k_w1, (C_IN, HIDDEN), jnp.float32) * 0.1,
        b1=jnp.zeros((1, HIDDEN), jnp.float32),
        w2=jax.random.normal(k_w2, (HIDDEN, N_CLS), jnp.float32) * 0.1,
        b2=jnp.zeros((1, N_CLS), jnp.float32),
    )
    feat = jax.random.normal(k_feat, (N_POINTS, C_IN), jnp.float32)
    segment = jax.random.randint(k_seg, (N_POINTS,), -1, N_CLS, dtype=jnp.int32)
    input_dict = dict(feat=feat, segment=segment, condition=["ScanNet"])

    # eval path with labels: loss + seg_logits
    model = DefaultSegmentor(params, training=False, tile_n=TILE_N)
    out = model.forward(input_dict)
    jax.block_until_ready(out["seg_logits"])
    jax.block_until_ready(out["loss"])

    # training path: loss only (no logits writeback)
    out_train = DefaultSegmentor(params, training=True, tile_n=TILE_N).forward(input_dict)
    jax.block_until_ready(out_train["loss"])

    # inference-only path (no 'segment')
    out_infer = model.forward(dict(feat=feat, condition=["ScanNet"]))
    jax.block_until_ready(out_infer["seg_logits"])

    # sanity check against a pure-JAX reference (same bf16 quantization;
    # returned logits are additionally bf16-rounded by the lane-dense store)
    ref_logits, ref_loss = _reference(feat, params, segment, N_CLS)
    assert out["seg_logits"].shape == (N_POINTS, N_CLS)
    assert jnp.allclose(out["seg_logits"], ref_logits, atol=2e-2)
    assert jnp.allclose(out_infer["seg_logits"], ref_logits, atol=2e-2)
    assert jnp.allclose(out["loss"], ref_loss, atol=5e-3)
    assert jnp.allclose(out_train["loss"], ref_loss, atol=5e-3)

    print("KERNEL_OK")
</pallas_src>

<mosaic_0001>
module attributes {stable_mosaic.version = 11 : i64} {
  func.func @_fused_kernel(%arg0: i32, %arg1: memref<256x16xf32, #tpu.memory_space<vmem>>, %arg2: memref<16x128xbf16, #tpu.memory_space<vmem>>, %arg3: memref<1x128xf32, #tpu.memory_space<vmem>>, %arg4: memref<128x128xbf16, #tpu.memory_space<vmem>>, %arg5: memref<1x128xf32, #tpu.memory_space<vmem>>, %arg6: memref<256x1xi32, #tpu.memory_space<vmem>>, %arg7: memref<256x128xbf16, #tpu.memory_space<vmem>>, %arg8: memref<1x8x128xf32, #tpu.memory_space<vmem>>) attributes {dimension_semantics = [#tpu.dimension_semantics<parallel>], iteration_bounds = array<i64: 4>, scalar_prefetch = 0 : i64, scratch_operands = 0 : i64, tpu.core_type = #tpu.core_type<tc>, window_params = [{transform_indices = @transform_0, window_bounds = array<i64: 256, 16>}, {pipeline_mode = #tpu.pipeline_mode<synchronous>, transform_indices = @transform_1, window_bounds = array<i64: 16, 128>}, {pipeline_mode = #tpu.pipeline_mode<synchronous>, transform_indices = @transform_2, window_bounds = array<i64: 1, 128>}, {pipeline_mode = #tpu.pipeline_mode<synchronous>, transform_indices = @transform_3, window_bounds = array<i64: 128, 128>}, {pipeline_mode = #tpu.pipeline_mode<synchronous>, transform_indices = @transform_4, window_bounds = array<i64: 1, 128>}, {transform_indices = @transform_5, window_bounds = array<i64: 256, 1>}, {transform_indices = @transform_6, window_bounds = array<i64: 256, 128>}, {transform_indices = @transform_7, window_bounds = array<i64: 1, 8, 128>}]} {
    %c0 = arith.constant 0 : index
    %c0_0 = arith.constant 0 : index
    %0 = vector.load %arg1[%c0, %c0_0] : memref<256x16xf32, #tpu.memory_space<vmem>>, vector<256x16xf32>
    %1 = arith.truncf %0 : vector<256x16xf32> to vector<256x16xbf16>
    %c0_1 = arith.constant 0 : index
    %c0_2 = arith.constant 0 : index
    %2 = vector.load %arg2[%c0_1, %c0_2] : memref<16x128xbf16, #tpu.memory_space<vmem>>, vector<16x128xbf16>
    %cst = arith.constant dense<0.000000e+00> : vector<256x128xf32>
    %3 = tpu.matmul %1, %2, %cst {dimension_numbers = #tpu.dot_dimension_numbers<[1], [0], [0], [1], [0, 0, 1, 1], [], []>} : vector<256x16xbf16>, vector<16x128xbf16>, vector<256x128xf32> -> vector<256x128xf32>
    %c0_3 = arith.constant 0 : index
    %c0_4 = arith.constant 0 : index
    %4 = vector.load %arg3[%c0_3, %c0_4] : memref<1x128xf32, #tpu.memory_space<vmem>>, vector<1x128xf32>
    %5 = vector.broadcast %4 : vector<1x128xf32> to vector<256x128xf32>
    %6 = arith.addf %3, %5 : vector<256x128xf32>
    %cst_5 = arith.constant 0.000000e+00 : f32
    %7 = vector.broadcast %cst_5 : f32 to vector<256x128xf32>
    %8 = arith.maximumf %6, %7 : vector<256x128xf32>
    %9 = arith.truncf %8 : vector<256x128xf32> to vector<256x128xbf16>
    %c0_6 = arith.constant 0 : index
    %c0_7 = arith.constant 0 : index
    %10 = vector.load %arg4[%c0_6, %c0_7] : memref<128x128xbf16, #tpu.memory_space<vmem>>, vector<128x128xbf16>
    %cst_8 = arith.constant dense<0.000000e+00> : vector<256x128xf32>
    %11 = tpu.matmul %9, %10, %cst_8 {dimension_numbers = #tpu.dot_dimension_numbers<[1], [0], [0], [1], [0, 0, 1, 1], [], []>} : vector<256x128xbf16>, vector<128x128xbf16>, vector<256x128xf32> -> vector<256x128xf32>
    %c0_9 = arith.constant 0 : index
    %c0_10 = arith.constant 0 : index
    %12 = vector.load %arg5[%c0_9, %c0_10] : memref<1x128xf32, #tpu.memory_space<vmem>>, vector<1x128xf32>
    %13 = vector.broadcast %12 : vector<1x128xf32> to vector<256x128xf32>
    %14 = arith.addf %11, %13 : vector<256x128xf32>
    %15 = arith.truncf %14 : vector<256x128xf32> to vector<256x128xbf16>
    %c0_11 = arith.constant 0 : index
    %c0_12 = arith.constant 0 : index
    %16 = vector.load %arg7[%c0_11, %c0_12] : memref<256x128xbf16, #tpu.memory_space<vmem>>, vector<256x128xbf16>
    tpu.vector_store %arg7[%c0_11, %c0_12], %15 {strides = array<i32>} : memref<256x128xbf16, #tpu.memory_space<vmem>>, vector<256x128xbf16>,
    %c0_13 = arith.constant 0 : index
    %c0_14 = arith.constant 0 : index
    %17 = vector.load %arg6[%c0_13, %c0_14] : memref<256x1xi32, #tpu.memory_space<vmem>>, vector<256x1xi32>
    %18 = tpu.iota {dimensions = array<i32: 1>} : vector<256x128xi32>
    %c13_i32 = arith.constant 13 : i32
    %19 = vector.broadcast %c13_i32 : i32 to vector<256x128xi32>
    %20 = arith.cmpi slt, %18, %19 : vector<256x128xi32>
    %cst_15 = arith.constant -1.000000e+30 : f32
    %21 = vector.broadcast %cst_15 : f32 to vector<256x128xf32>
    %22 = arith.select %20, %14, %21 : vector<256x128xi1>, vector<256x128xf32>
    %cst_16 = arith.constant dense<0xFF800000> : vector<256xf32>
    %23 = vector.multi_reduction <maximumf>, %22, %cst_16 [1] : vector<256x128xf32> to vector<256xf32>
    %24 = vector.shape_cast %23 : vector<256xf32> to vector<256x1xf32>
    %25 = vector.broadcast %24 : vector<256x1xf32> to vector<256x128xf32>
    %26 = arith.subf %22, %25 : vector<256x128xf32>
    %27 = math.exp %26 : vector<256x128xf32>
    %cst_17 = arith.constant 0.000000e+00 : f32
    %28 = vector.broadcast %cst_17 : f32 to vector<256x128xf32>
    %29 = arith.select %20, %27, %28 : vector<256x128xi1>, vector<256x128xf32>
    %cst_18 = arith.constant dense<0.000000e+00> : vector<256xf32>
    %30 = vector.multi_reduction <add>, %29, %cst_18 [1] : vector<256x128xf32> to vector<256xf32>
    %31 = vector.shape_cast %30 : vector<256xf32> to vector<256x1xf32>
    %32 = math.log %31 : vector<256x1xf32>
    %33 = arith.addf %24, %32 : vector<256x1xf32>
    %34 = vector.broadcast %17 : vector<256x1xi32> to vector<256x128xi32>
    %35 = arith.cmpi eq, %18, %34 : vector<256x128xi32>
    %cst_19 = arith.constant 0.000000e+00 : f32
    %36 = vector.broadcast %cst_19 : f32 to vector<256x128xf32>
    %37 = arith.select %35, %14, %36 : vector<256x128xi1>, vector<256x128xf32>
    %cst_20 = arith.constant dense<0.000000e+00> : vector<256xf32>
    %38 = vector.multi_reduction <add>, %37, %cst_20 [1] : vector<256x128xf32> to vector<256xf32>
    %39 = vector.shape_cast %38 : vector<256xf32> to vector<256x1xf32>
    %40 = arith.subf %33, %39 : vector<256x1xf32>
    %c256_i32 = arith.constant 256 : i32
    %41 = arith.muli %arg0, %c256_i32 : i32
    %42 = tpu.iota {dimensions = array<i32: 0>} : vector<256x1xi32>
    %43 = vector.broadcast %41 : i32 to vector<256x1xi32>
    %44 = arith.addi %43, %42 : vector<256x1xi32>
    %c0_i32 = arith.constant 0 : i32
    %45 = vector.broadcast %c0_i32 : i32 to vector<256x1xi32>
    %46 = arith.cmpi sge, %17, %45 : vector<256x1xi32>
    %c1000_i32 = arith.constant 1000 : i32
    %47 = vector.broadcast %c1000_i32 : i32 to vector<256x1xi32>
    %48 = arith.cmpi slt, %44, %47 : vector<256x1xi32>
    %49 = arith.andi %46, %48 : vector<256x1xi1>
    %cst_21 = arith.constant 0.000000e+00 : f32
    %50 = vector.broadcast %cst_21 : f32 to vector<256x1xf32>
    %51 = arith.select %49, %40, %50 : vector<256x1xi1>, vector<256x1xf32>
    %52 = vector.shape_cast %51 : vector<256x1xf32> to vector<1x256x1xf32>
    %cst_22 = arith.constant dense<0.000000e+00> : vector<1xf32>
    %53 = vector.multi_reduction <add>, %52, %cst_22 [1, 2] : vector<1x256x1xf32> to vector<1xf32>
    %54 = vector.shape_cast %53 : vector<1xf32> to vector<1x1x1xf32>
    %55 = vector.extract %54[0, 0, 0] : f32 from vector<1x1x1xf32>
    %56 = arith.extui %49 : vector<256x1xi1> to vector<256x1xi32>
    %57 = arith.sitofp %56 : vector<256x1xi32> to vector<256x1xf32>
    %58 = vector.shape_cast %57 : vector<256x1xf32> to vector<1x256x1xf32>
    %cst_23 = arith.constant dense<0.000000e+00> : vector<1xf32>
    %59 = vector.multi_reduction <add>, %58, %cst_23 [1, 2] : vector<1x256x1xf32> to vector<1xf32>
    %60 = vector.shape_cast %59 : vector<1xf32> to vector<1x1x1xf32>
    %61 = vector.extract %60[0, 0, 0] : f32 from vector<1x1x1xf32>
    %62 = tpu.iota {dimensions = array<i32: 1>} : vector<1x8x128xi32>
    %63 = tpu.iota {dimensions = array<i32: 2>} : vector<1x8x128xi32>
    %c0_i32_24 = arith.constant 0 : i32
    %64 = vector.broadcast %c0_i32_24 : i32 to vector<1x8x128xi32>
    %65 = arith.cmpi eq, %62, %64 : vector<1x8x128xi32>
    %c0_i32_25 = arith.constant 0 : i32
    %66 = vector.broadcast %c0_i32_25 : i32 to vector<1x8x128xi32>
    %67 = arith.cmpi eq, %63, %66 : vector<1x8x128xi32>
    %68 = arith.andi %65, %67 : vector<1x8x128xi1>
    %c0_i32_26 = arith.constant 0 : i32
    %69 = vector.broadcast %c0_i32_26 : i32 to vector<1x8x128xi32>
    %70 = arith.cmpi eq, %62, %69 : vector<1x8x128xi32>
    %c1_i32 = arith.constant 1 : i32
    %71 = vector.broadcast %c1_i32 : i32 to vector<1x8x128xi32>
    %72 = arith.cmpi eq, %63, %71 : vector<1x8x128xi32>
    %73 = arith.andi %70, %72 : vector<1x8x128xi1>
    %cst_27 = arith.constant 0.000000e+00 : f32
    %74 = vector.broadcast %61 : f32 to vector<1x8x128xf32>
    %75 = vector.broadcast %cst_27 : f32 to vector<1x8x128xf32>
    %76 = arith.select %73, %74, %75 : vector<1x8x128xi1>, vector<1x8x128xf32>
    %77 = vector.broadcast %55 : f32 to vector<1x8x128xf32>
    %78 = arith.select %68, %77, %76 : vector<1x8x128xi1>, vector<1x8x128xf32>
    %c0_28 = arith.constant 0 : index
    %c0_29 = arith.constant 0 : index
    %c0_30 = arith.constant 0 : index
    %79 = vector.load %arg8[%c0_28, %c0_29, %c0_30] : memref<1x8x128xf32, #tpu.memory_space<vmem>>, vector<1x8x128xf32>
    tpu.vector_store %arg8[%c0_28, %c0_29, %c0_30], %78 {strides = array<i32>} : memref<1x8x128xf32, #tpu.memory_space<vmem>>, vector<1x8x128xf32>,
    return
  }
  func.func @transform_0(%arg0: i32) -> (i32, i32) {
    %c0_i32 = arith.constant 0 : i32
    %c0_i32_0 = arith.constant 0 : i32
    return %arg0, %c0_i32 : i32, i32
  }
  func.func @transform_1(%arg0: i32) -> (i32, i32) {
    %c0_i32 = arith.constant 0 : i32
    %c0_i32_0 = arith.constant 0 : i32
    %c0_i32_1 = arith.constant 0 : i32
    return %c0_i32, %c0_i32_0 : i32, i32
  }
  func.func @transform_2(%arg0: i32) -> (i32, i32) {
    %c0_i32 = arith.constant 0 : i32
    %c0_i32_0 = arith.constant 0 : i32
    %c0_i32_1 = arith.constant 0 : i32
    return %c0_i32, %c0_i32_0 : i32, i32
  }
  func.func @transform_3(%arg0: i32) -> (i32, i32) {
    %c0_i32 = arith.constant 0 : i32
    %c0_i32_0 = arith.constant 0 : i32
    %c0_i32_1 = arith.constant 0 : i32
    return %c0_i32, %c0_i32_0 : i32, i32
  }
  func.func @transform_4(%arg0: i32) -> (i32, i32) {
    %c0_i32 = arith.constant 0 : i32
    %c0_i32_0 = arith.constant 0 : i32
    %c0_i32_1 = arith.constant 0 : i32
    return %c0_i32, %c0_i32_0 : i32, i32
  }
  func.func @transform_5(%arg0: i32) -> (i32, i32) {
    %c0_i32 = arith.constant 0 : i32
    %c0_i32_0 = arith.constant 0 : i32
    return %arg0, %c0_i32 : i32, i32
  }
  func.func @transform_6(%arg0: i32) -> (i32, i32) {
    %c0_i32 = arith.constant 0 : i32
    %c0_i32_0 = arith.constant 0 : i32
    return %arg0, %c0_i32 : i32, i32
  }
  func.func @transform_7(%arg0: i32) -> (i32, i32, i32) {
    %c0_i32 = arith.constant 0 : i32
    %c0_i32_0 = arith.constant 0 : i32
    %c0_i32_1 = arith.constant 0 : i32
    return %arg0, %c0_i32, %c0_i32_0 : i32, i32, i32
  }
}

</mosaic_0001>

<bundles_post_ra>
// kernel: tpu_custom_call.1
= control target key start
LH: loop header
LB: loop body
LE: loop exit
PB: predicated region body
PF: predicated region fallthrough
CT: control target
= control target key end

     0   :  { %s4574_s0 = inlined_call_operand.vmem [shape: f32[1000,16], index: 0, kind: input, shape index: {}]   ;;  %s4575_s1 = inlined_call_operand.vmem [shape: bf16[16,128], index: 1, kind: input, shape index: {}]   ;;  %s4576_s2 = inlined_call_operand.vmem [shape: f32[1,128], index: 2, kind: input, shape index: {}]   ;;  %s4577_s3 = inlined_call_operand.vmem [shape: bf16[128,128], index: 3, kind: input, shape index: {}]   ;;  %s4578_s4 = inlined_call_operand.vmem [shape: f32[1,128], index: 4, kind: input, shape index: {}]   ;;  %s4579_s5 = inlined_call_operand.vmem [shape: s32[1000,1], index: 5, kind: input, shape index: {}]   ;;  %s4580_s6 = inlined_call_operand.hbm [shape: bf16[1000,128], index: 6, kind: output, shape index: {0}]   ;;  %s4581_s7 = inlined_call_operand.hbm [shape: f32[4,8,128], index: 7, kind: output, shape index: {1}]  }
   0x1   :  { %4655 = sst [smem:[#allocation55_spill]] %s4574_s0 }
   0x2   :  { %4656 = sst [smem:[#allocation56_spill]] %s4575_s1 }
   0x3   :  { %13 = vsyncpa [#allocation3], 0 }
   0x4   :  { %15 = vsyncpa [#allocation3 + $0x1], 0 }
   0x5   :  { %16 = vsyncpa [#allocation5], 0 }
   0x6   :  { %18 = vsyncpa [#allocation5 + $0x1], 0  ;;  %s3048_s24 = smov 0   ;;  %s3050_s25 = smov 0  }
   0x7   :  { %s3052_s26 = smov 0   ;;  %s3054_s27 = smov 0  }
   0x8 LB: > { %s3069_s28 = sadd.s32 4294967295, %s3000_s27   ;;  %s2304_s29 = sadd.s32 4294967294, %s3000_s27   ;;  %s3000_s27 = sphi %s3054_s27, %s4921_s27   ;;  %s2996_s26 = sphi %s3052_s26, %s4920_s26   ;;  %s2992_s25 = sphi %s3050_s25, %s4919_s25   ;;  %s2988_s24 = sphi %s3048_s24, %s4918_s24  }
   0x9   : > { %s3073_s30 = sadd.s32 1, %s3000_s27   ;;  %s167_s8 = sadd.s32 1, %s2996_s26 }
   0xa   : > { %s164_s9 = ssub.s32 %s3000_s27, %s3073_s30  ;;  %p177_p0 = scmp.ne.s32.totalorder %s2996_s26, %s2992_s25 }
   0xb   : > { %p165_p1 = scmp.eq.s32.totalorder %s164_s9, 0  ;;  %p178_p2 = scmp.eq.s32.totalorder %s3069_s28, 3 }
   0xc   : > { %p183_p3 = scmp.ne.s32.totalorder %s2992_s25, %s2988_s24  ;;  %p184_p4 = scmp.eq.s32.totalorder %s2304_s29, 3 }
   0xd   : > { %s3084_s10 = scalar_select %p165_p1, %s2996_s26, %s167_s8  }
   0xe   : > { %p3086_p5 = por %p178_p2, %p177_p0  ;;  %p3090_p6 = por %p184_p4, %p183_p3 }
   0xf   : > { %p2307_p7 = scmp.ge.s32.totalorder %s3000_s27, 1  ;;  %p274_p8 = scmp.lt.s32.totalorder %s3000_s27, 5 }
  0x11   : > { %p275_p9 = pnand %p2307_p7, %p274_p8 }
  0x13   : > { %278 = sbr.rel (%p275_p9) target bundleno = 1183 (0x49f), region = 44 }
  0x1a   : > { %s4659_s1 = sld [smem:[#allocation56_spill]]  ;;  %s3100_s15 = sshll.u32 %s3069_s28, 5  ;;  %v2738_v1 = vld [vmem:[%s4577_s3] sm:$0xff]   ;;  %v2739_v2 = vld [vmem:[%s4577_s3 + $0x8] sm:$0xff]   ;;  %v2740_v3 = vld [vmem:[%s4577_s3 + $0x10] sm:$0xff]   ;;  %vm421_vm0 = vcmask 130048  }
  0x1b   : > { %p329_p10 = scmp.lt.s32.totalorder %s3100_s15, 124  ;;  %2668 = vmatprep.subr.bf16.mxu1 %v2738_v1  ;;  %s4660_s0 = sld [smem:[#allocation55_spill]]  ;;  %v2741_v15 = vld [vmem:[%s4577_s3 + $0x18] sm:$0xff]   ;;  %v2742_v20 = vld [vmem:[%s4577_s3 + $0x20] sm:$0xff]   ;;  %v2743_v23 = vld [vmem:[%s4577_s3 + $0x28] sm:$0xff]   ;;  %v3002_v57 = vmov 0  }
  0x1c   : > { %2676 = vmatpush3.bf16.msra.mxu1 %v2738_v1  ;;  %v2744_v28 = vld [vmem:[%s4577_s3 + $0x30] sm:$0xff]   ;;  %v2745_v56 = vld [vmem:[%s4577_s3 + $0x38] sm:$0xff]   ;;  %2736 = vset.pattern.permute.xlu1 %v3002_v57  ;;  %s2373_s23 = sshll.u32 %s3069_s28, 8 }
  0x1d   : > { %s3107_s18 = scalar_select %p329_p10, %s3100_s15, 124  ;;  %2669 = vmatprep.subr.bf16.mxu1 %v2739_v2  ;;  %2735 = vset.pattern.permute.xlu0 %v3002_v57 }
  0x1f   : > { %s2311_s21 = sshll.u32 %s3107_s18, 3 }
  0x20   : > { %v2737_v0 = vld [vmem:[%s4659_s1] sm:$0xff]   ;;  %2677 = vmatpush3.bf16.msra.mxu1 %v2739_v2  ;;  %s3191_s16 = scalar_lea.vmem %s4579_s5, %s2311_s21 }
  0x21   : > { %2586 = vmatprep.subr.bf16.mxu0 %v2737_v0  ;;  %s3118_s29 = scalar_lea.vmem %s4660_s0, %s2311_s21  ;;  %2670 = vmatprep.subr.bf16.mxu1 %v2740_v3  ;;  %v1072_v58 = vld [vmem:[%s3191_s16 + $0x8] sm:$0xff]  ;;  %v1074_v59 = vld [vmem:[%s3191_s16 + $0x18] sm:$0xff]  ;;  %s2174_s21 = ssub.s32 (%p3086_p5), 125, %s3100_s15 }
  0x22   : > { %2587 = vmatpush3.bf16.msra.mxu0 %v2737_v0  ;;  %v358_v4 = vld [vmem:[%s3118_s29] sm:$0xff]  ;;  %v359_v5 = vld [vmem:[%s3118_s29 + $0x8] sm:$0xff]  ;;  %v360_v6 = vld [vmem:[%s3118_s29 + $0x10] sm:$0xff]  ;;  %1494 = vperm.xlu1 %2736, %v1072_v58   ;;  %p2175_p11 = scmp.lt.s32.totalorder (%p3086_p5), %s2174_s21, 32 }
  0x23   : > { %2620 = vmatprep.subr.bf16.mxu0 %v2738_v1  ;;  %v390_v7 = vpack.c.bf16 %v359_v5, %v358_v4  ;;  %v361_v8 = vld [vmem:[%s3118_s29 + $0x18] sm:$0xff]  ;;  %v362_v9 = vld [vmem:[%s3118_s29 + $0x20] sm:$0xff]  ;;  %v363_v10 = vld [vmem:[%s3118_s29 + $0x28] sm:$0xff] }
  0x24   : > { %v391_v11 = vpack.c.bf16 %v361_v8, %v360_v6  ;;  %v392_v12 = vpack.c.bf16 %v363_v10, %v362_v9  ;;  %v364_v13 = vld [vmem:[%s3118_s29 + $0x30] sm:$0xff]  ;;  %v365_v14 = vld [vmem:[%s3118_s29 + $0x38] sm:$0xff]  ;;  %v366_v16 = vld [vmem:[%s3118_s29 + $0x40] sm:$0xff]  ;;  %2678 = vmatpush3.bf16.msra.mxu1 %v2740_v3 }
  0x25   : > { %2588 = vmatprep.mubr.msk.bf16.mxu0 %vm421_vm0, %v390_v7  ;;  %v367_v17 = vld [vmem:[%s3118_s29 + $0x48] sm:$0xff]  ;;  %2671 = vmatprep.subr.bf16.mxu1 %v2741_v15  ;;  %v393_v18 = vpack.c.bf16 %v365_v14, %v364_v13  ;;  %v368_v21 = vld [vmem:[%s3118_s29 + $0x50] sm:$0xff]  ;;  %v369_v22 = vld [vmem:[%s3118_s29 + $0x58] sm:$0xff] }
  0x26   : > { %2589 = vmatmul.mubr.msk.bf16.vlgmr.msra.gmra.mrb[0].mxu0 %vm421_vm0, %v391_v11  ;;  %v394_v19 = vpack.c.bf16 %v367_v17, %v366_v16  ;;  %v370_v24 = vld [vmem:[%s3118_s29 + $0x60] sm:$0xff]  ;;  %v371_v25 = vld [vmem:[%s3118_s29 + $0x68] sm:$0xff]  ;;  %v395_v26 = vpack.c.bf16 %v369_v22, %v368_v21  ;;  %v372_v29 = vld [vmem:[%s3118_s29 + $0x70] sm:$0xff]  ;;  %1500 = vperm.xlu1 %2736, %v1074_v59  }
  0x27   : > { %2592 = vmatprep.mubr.msk.bf16.mxu0 %vm421_vm0, %v392_v12  ;;  %2621 = vmatpush3.bf16.msra.mxu0 %v2738_v1  ;;  %v396_v27 = vpack.c.bf16 %v371_v25, %v370_v24  ;;  %v373_v30 = vld [vmem:[%s3118_s29 + $0x78] sm:$0xff]  ;;  %v374_v31 = vld [vmem:[%s3118_s29 + $0x80] sm:$0xff]  ;;  %v375_v32 = vld [vmem:[%s3118_s29 + $0x88] sm:$0xff] }
  0x28   : > { %2622 = vmatprep.subr.bf16.mxu0 %v2739_v2  ;;  %2679 = vmatpush3.bf16.msra.mxu1 %v2741_v15  ;;  %v397_v33 = vpack.c.bf16 %v373_v30, %v372_v29  ;;  %v398_v34 = vpack.c.bf16 %v375_v32, %v374_v31  ;;  %v376_v35 = vld [vmem:[%s3118_s29 + $0x90] sm:$0xff]  ;;  %v377_v36 = vld [vmem:[%s3118_s29 + $0x98] sm:$0xff]  ;;  %v378_v37 = vld [vmem:[%s3118_s29 + $0xa0] sm:$0xff] }
  0x29   : > { %2672 = vmatprep.subr.bf16.mxu1 %v2742_v20  ;;  %v379_v38 = vld [vmem:[%s3118_s29 + $0xa8] sm:$0xff]  ;;  %v399_v39 = vpack.c.bf16 %v377_v36, %v376_v35  ;;  %v380_v41 = vld [vmem:[%s3118_s29 + $0xb0] sm:$0xff]  ;;  %v381_v42 = vld [vmem:[%s3118_s29 + $0xb8] sm:$0xff] }
  0x2a   : > { %v400_v40 = vpack.c.bf16 %v379_v38, %v378_v37  ;;  %v382_v43 = vld [vmem:[%s3118_s29 + $0xc0] sm:$0xff]  ;;  %v383_v44 = vld [vmem:[%s3118_s29 + $0xc8] sm:$0xff]  ;;  %v401_v45 = vpack.c.bf16 %v381_v42, %v380_v41  ;;  %v384_v47 = vld [vmem:[%s3118_s29 + $0xd0] sm:$0xff] }
  0x2b   : > { %2623 = vmatpush3.bf16.msra.mxu0 %v2739_v2  ;;  %v402_v46 = vpack.c.bf16 %v383_v44, %v382_v43  ;;  %v385_v48 = vld [vmem:[%s3118_s29 + $0xd8] sm:$0xff]  ;;  %v386_v49 = vld [vmem:[%s3118_s29 + $0xe0] sm:$0xff]  ;;  %v387_v50 = vld [vmem:[%s3118_s29 + $0xe8] sm:$0xff] }
  0x2c   : > { %2624 = vmatprep.subr.bf16.mxu0 %v2740_v3  ;;  %2680 = vmatpush3.bf16.msra.mxu1 %v2742_v20  ;;  %v403_v51 = vpack.c.bf16 %v385_v48, %v384_v47  ;;  %v404_v52 = vpack.c.bf16 %v387_v50, %v386_v49  ;;  %v388_v53 = vld [vmem:[%s3118_s29 + $0xf0] sm:$0xff]  ;;  %v389_v54 = vld [vmem:[%s3118_s29 + $0xf8] sm:$0xff]  ;;  %v1076_v60 = vld [vmem:[%s3191_s16 + $0x28] sm:$0xff]  ;;  %s3263_s29 = sand.u32 1, %s2992_s25  }
  0x2d   : > { %2673 = vmatprep.subr.bf16.mxu1 %v2743_v23  ;;  %v405_v55 = vpack.c.bf16 %v389_v54, %v388_v53  ;;  %1506 = vperm.xlu1 %2736, %v1076_v60   ;;  %v1078_v61 = vld [vmem:[%s3191_s16 + $0x38] sm:$0xff]  ;;  %v1080_v62 = vld [vmem:[%s3191_s16 + $0x48] sm:$0xff]  ;;  %v1071_v0 = vld [vmem:[%s3191_s16] sm:$0xff]  ;;  %s2308_s20 = sshll.u32 %s3263_s29, 7  ;;  %s2309_s8 = sshll.u32 %s3263_s29, 3 }
  0x2e   : > { %2593 = vmatmul.mubr.msk.bf16.gmra.mrb[4].mxu0 %vm421_vm0, %v393_v18  ;;  %v1082_v63 = vld [vmem:[%s3191_s16 + $0x58] sm:$0xff]  ;;  %1491 = vperm.xlu0 %2735, %v1071_v0   ;;  %v1084_v1 = vld [vmem:[%s3191_s16 + $0x68] sm:$0xff]  ;;  %v1073_v2 = vld [vmem:[%s3191_s16 + $0x10] sm:$0xff]  ;;  %s3285_s22 = scalar_lea.vmem [#allocation2], %s2308_s20  ;;  %s4489_s14 = scalar_lea.vmem [#allocation4], %s2309_s8 }
  0x2f   : > { %2596 = vmatprep.mubr.msk.bf16.mxu0 %vm421_vm0, %v394_v19  ;;  %2625 = vmatpush3.bf16.msra.mxu0 %v2740_v3  ;;  %v1085_v3 = vld [vmem:[%s3191_s16 + $0x70] sm:$0xff]  ;;  %v1075_v4 = vld [vmem:[%s3191_s16 + $0x20] sm:$0xff]  ;;  %v1086_v5 = vld [vmem:[%s3191_s16 + $0x78] sm:$0xff] }
  0x30   : > { %2626 = vmatprep.subr.bf16.mxu0 %v2741_v15  ;;  %2681 = vmatpush3.bf16.msra.mxu1 %v2743_v23  ;;  %v1077_v6 = vld [vmem:[%s3191_s16 + $0x30] sm:$0xff]  ;;  %v1087_v7 = vld [vmem:[%s3191_s16 + $0x80] sm:$0xff]  ;;  %v1090_v11 = vld [vmem:[%s3191_s16 + $0x98] sm:$0xff] }
  0x31   : > { %2674 = vmatprep.subr.bf16.mxu1 %v2744_v28  ;;  %1512 = vperm.xlu1 %2736, %v1078_v61   ;;  %v1079_v8 = vld [vmem:[%s3191_s16 + $0x40] sm:$0xff]  ;;  %v1089_v9 = vld [vmem:[%s3191_s16 + $0x90] sm:$0xff]  ;;  %v1088_v14 = vld [vmem:[%s3191_s16 + $0x88] sm:$0xff] }
  0x32   : > { %1497 = vperm.xlu0 %2735, %v1073_v2   ;;  %v1081_v10 = vld [vmem:[%s3191_s16 + $0x50] sm:$0xff]  ;;  %v1083_v12 = vld [vmem:[%s3191_s16 + $0x60] sm:$0xff]  ;;  %v1094_v16 = vld [vmem:[%s3191_s16 + $0xb8] sm:$0xff] }
  0x33   : > { %2627 = vmatpush3.bf16.msra.mxu0 %v2741_v15  ;;  %v1091_v13 = vld [vmem:[%s3191_s16 + $0xa0] sm:$0xff]  ;;  %v1092_v15 = vld [vmem:[%s3191_s16 + $0xa8] sm:$0xff]  ;;  %v1093_v17 = vld [vmem:[%s3191_s16 + $0xb0] sm:$0xff] }
  0x34   : > { %2628 = vmatprep.subr.bf16.mxu0 %v2742_v20  ;;  %2682 = vmatpush3.bf16.msra.mxu1 %v2744_v28  ;;  %v1096_v18 = vld [vmem:[%s3191_s16 + $0xc8] sm:$0xff]  ;;  %v1095_v19 = vld [vmem:[%s3191_s16 + $0xc0] sm:$0xff]  ;;  %v1097_v21 = vld [vmem:[%s3191_s16 + $0xd0] sm:$0xff] }
  0x35   : > { %2675 = vmatprep.subr.bf16.mxu1 %v2745_v56  ;;  %1518 = vperm.xlu1 %2736, %v1080_v62   ;;  %v1101_v22 = vld [vmem:[%s3191_s16 + $0xf0] sm:$0xff]  ;;  %v1100_v24 = vld [vmem:[%s3191_s16 + $0xe8] sm:$0xff]  ;;  %v1102_v25 = vld [vmem:[%s3191_s16 + $0xf8] sm:$0xff] }
  0x36   : > { %2597 = vmatmul.mubr.msk.bf16.gmra.mrb[8].mxu0 %vm421_vm0, %v395_v26  ;;  %1503 = vperm.xlu0 %2735, %v1075_v4   ;;  %v3228_v26 = vld [vmem:[%s4576_s2] ss:$0 sm:$0xff] }
  0x37   : > { %2600 = vmatprep.mubr.msk.bf16.mxu0 %vm421_vm0, %v396_v27  ;;  %2629 = vmatpush3.bf16.msra.mxu0 %v2742_v20  ;;  %v1098_v20 = vld [vmem:[%s3191_s16 + $0xd8] sm:$0xff] }
  0x38   : > { %2630 = vmatprep.subr.bf16.mxu0 %v2743_v23  ;;  %2683 = vmatpush3.bf16.msra.mxu1 %v2745_v56 }
  0x39   : > { %1524 = vperm.xlu1 %2736, %v1082_v63  }
  0x3a   : > { %1509 = vperm.xlu0 %2735, %v1077_v6  }
  0x3b   : > { %2631 = vmatpush3.bf16.msra.mxu0 %v2743_v23  ;;  %v1099_v23 = vld [vmem:[%s3191_s16 + $0xe0] sm:$0xff] }
  0x3c   : > { %2632 = vmatprep.subr.bf16.mxu0 %v2744_v28 }
  0x3d   : > { %1530 = vperm.xlu1 %2736, %v1084_v1  }
  0x3e   : > { %2601 = vmatmul.mubr.msk.bf16.gmra.mrb[12].mxu0 %vm421_vm0, %v397_v33  ;;  %1515 = vperm.xlu0 %2735, %v1079_v8  }
  0x3f   : > { %2604 = vmatprep.mubr.msk.bf16.mxu0 %vm421_vm0, %v398_v34  ;;  %2633 = vmatpush3.bf16.msra.mxu0 %v2744_v28 }
  0x40   : > { %2634 = vmatprep.subr.bf16.mxu0 %v2745_v56 }
  0x41   : > { %1533 = vperm.xlu1 %2736, %v1085_v3  }
  0x42   : > { %1521 = vperm.xlu0 %2735, %v1081_v10  }
  0x43   : > { %2635 = vmatpush3.bf16.msra.mxu0 %v2745_v56 }
  0x45   : > { %1536 = vperm.xlu1 %2736, %v1086_v5  }
  0x46   : > { %2605 = vmatmul.mubr.msk.bf16.gmra.mrb[16].mxu0 %vm421_vm0, %v399_v39  ;;  %1527 = vperm.xlu0 %2735, %v1083_v12  }
  0x47   : > { %2608 = vmatprep.mubr.msk.bf16.mxu0 %vm421_vm0, %v400_v40 }
  0x49   : > { %1539 = vperm.xlu1 %2736, %v1087_v7  }
  0x4a   : > { %1542 = vperm.xlu0 %2735, %v1088_v14  }
  0x4d   : > { %1545 = vperm.xlu1 %2736, %v1089_v9  }
  0x4e   : > { %2609 = vmatmul.mubr.msk.bf16.gmra.mrb[20].mxu0 %vm421_vm0, %v401_v45  ;;  %1560 = vperm.xlu0 %2735, %v1094_v16  }
  0x4f   : > { %2612 = vmatprep.mubr.msk.bf16.mxu0 %vm421_vm0, %v402_v46 }
  0x51   : > { %1548 = vperm.xlu1 %2736, %v1090_v11  }
  0x52   : > { %1566 = vperm.xlu0 %2735, %v1096_v18  }
  0x55   : > { %1551 = vperm.xlu1 %2736, %v1091_v13  }
  0x56   : > { %2613 = vmatmul.mubr.msk.bf16.gmra.mrb[24].mxu0 %vm421_vm0, %v403_v51  ;;  %1572 = vperm.xlu0 %2735, %v1098_v20  }
  0x57   : > { %2616 = vmatprep.mubr.msk.bf16.mxu0 %vm421_vm0, %v404_v52 }
  0x59   : > { %1554 = vperm.xlu1 %2736, %v1092_v15  }
  0x5a   : > { %1581 = vperm.xlu0 %2735, %v1101_v22  }
  0x5d   : > { %1557 = vperm.xlu1 %2736, %v1093_v17  }
  0x5e   : > { %2617 = vmatmul.mubr.msk.bf16.gmra.mrb[28].mxu0 %vm421_vm0, %v405_v55 }
  0x61   : > { %1563 = vperm.xlu1 %2736, %v1095_v19  }
  0x65   : > { %1569 = vperm.xlu1 %2736, %v1097_v21  }
  0x69   : > { %1575 = vperm.xlu1 %2736, %v1099_v23  }
  0x6d   : > { %1578 = vperm.xlu1 %2736, %v1100_v24  }
  0x71   : > { %1584 = vperm.xlu1 %2736, %v1102_v25  }
  0xf9   : > { %v2590_v27 = vpop.f32.mrb[0].mxu0 }
  0xfa   : > { %v513_v28 = vadd.f32 %v2590_v27, %v3228_v26  ;;  %v504_v29 = vpop.f32.mrb[1].mxu0 }
  0xfb   : > { %v505_v30 = vadd.f32 %v3228_v26, %v504_v29  ;;  %v2591_v31 = vpop.f32.mrb[2].mxu0 }
  0xfc   : > { %v516_v32 = vadd.f32 %v2591_v31, %v3228_v26  ;;  %v507_v33 = vpop.f32.mrb[3].mxu0  ;;  %v633_v35 = vmax.f32 %v513_v28, 0.0 }
  0xfd   : > { %v508_v34 = vadd.f32 %v3228_v26, %v507_v33  ;;  %v631_v37 = vmax.f32 %v505_v30, 0.0 }
  0xfe   : > { %v634_v36 = vmax.f32 %v516_v32, 0.0 }
  0xff   : > { %v632_v38 = vmax.f32 %v508_v34, 0.0 }
 0x100   : > { %v664_v39 = vpack.c.bf16 %v634_v36, %v633_v35 }
 0x101   : > { %v663_v40 = vpack.c.bf16 %v632_v38, %v631_v37  ;;  %v2594_v41 = vpop.f32.mrb[4].mxu0 }
 0x102   : > { %v529_v42 = vadd.f32 %v2594_v41, %v3228_v26  ;;  %v520_v43 = vpop.f32.mrb[5].mxu0 }
 0x103   : > { %v521_v44 = vadd.f32 %v3228_v26, %v520_v43  ;;  %v2595_v45 = vpop.f32.mrb[6].mxu0  ;;  %2636 = vmatprep.mubr.bf16.mxu0 %v663_v40 }
 0x104   : > { %v637_v46 = vmax.f32 %v529_v42, 0.0  ;;  %v532_v47 = vadd.f32 %v2595_v45, %v3228_v26  ;;  %v523_v48 = vpop.f32.mrb[7].mxu0  ;;  %2637 = vmatmul.mubr.bf16.vlgmr.msra.gmra.mrb[32].mxu0 %v664_v39 }
 0x105   : > { %v635_v49 = vmax.f32 %v521_v44, 0.0  ;;  %v524_v50 = vadd.f32 %v3228_v26, %v523_v48 }
 0x106   : > { %v638_v51 = vmax.f32 %v532_v47, 0.0 }
 0x107   : > { %v636_v52 = vmax.f32 %v524_v50, 0.0 }
 0x108   : > { %v666_v53 = vpack.c.bf16 %v638_v51, %v637_v46 }
 0x109   : > { %v2598_v54 = vpop.f32.mrb[8].mxu0  ;;  %v665_v55 = vpack.c.bf16 %v636_v52, %v635_v49 }
 0x10a   : > { %v545_v56 = vadd.f32 %v2598_v54, %v3228_v26  ;;  %v536_v57 = vpop.f32.mrb[9].mxu0 }
 0x10b   : > { %v537_v58 = vadd.f32 %v3228_v26, %v536_v57  ;;  %v2599_v59 = vpop.f32.mrb[10].mxu0  ;;  %2640 = vmatprep.mubr.bf16.mxu1 %v665_v55 }
 0x10c   : > { %v641_v60 = vmax.f32 %v545_v56, 0.0  ;;  %v548_v61 = vadd.f32 %v2599_v59, %v3228_v26  ;;  %v539_v62 = vpop.f32.mrb[11].mxu0  ;;  %2641 = vmatmul.mubr.bf16.vlgmr.msra.gmra.mrb[0].mxu1 %v666_v53 }
 0x10d   : > { %v639_v63 = vmax.f32 %v537_v58, 0.0  ;;  %v540_v0 = vadd.f32 %v3228_v26, %v539_v62 }
 0x10e   : > { %v642_v1 = vmax.f32 %v548_v61, 0.0 }
 0x10f   : > { %v640_v2 = vmax.f32 %v540_v0, 0.0 }
 0x110   : > { %v668_v3 = vpack.c.bf16 %v642_v1, %v641_v60 }
 0x111   : > { %v667_v4 = vpack.c.bf16 %v640_v2, %v639_v63  ;;  %v2602_v5 = vpop.f32.mrb[12].mxu0 }
 0x112   : > { %v561_v6 = vadd.f32 %v2602_v5, %v3228_v26  ;;  %v552_v7 = vpop.f32.mrb[13].mxu0 }
 0x113   : > { %v553_v8 = vadd.f32 %v3228_v26, %v552_v7  ;;  %v2603_v9 = vpop.f32.mrb[14].mxu0  ;;  %2644 = vmatprep.mubr.bf16.mxu1 %v667_v4 }
 0x114   : > { %v645_v10 = vmax.f32 %v561_v6, 0.0  ;;  %v564_v11 = vadd.f32 %v2603_v9, %v3228_v26  ;;  %v555_v12 = vpop.f32.mrb[15].mxu0  ;;  %2645 = vmatmul.mubr.bf16.gmra.mrb[4].mxu1 %v668_v3 }
 0x115   : > { %v643_v13 = vmax.f32 %v553_v8, 0.0  ;;  %v556_v14 = vadd.f32 %v3228_v26, %v555_v12  ;;  %v4582_v12 = vlaneseq }
 0x116   : > { %v646_v15 = vmax.f32 %v564_v11, 0.0 }
 0x117   : > { %v644_v16 = vmax.f32 %v556_v14, 0.0  ;;  %v3266_v14 = vand.u32 127, %v4582_v12 }
 0x118   : > { %v670_v17 = vpack.c.bf16 %v646_v15, %v645_v10  ;;  %v3271_v15 = vld [vmem:[%s4578_s4] ss:$0 sm:$0xff] }
 0x119   : > { %v669_v18 = vpack.c.bf16 %v644_v16, %v643_v13  ;;  %v2606_v19 = vpop.f32.mrb[16].mxu0  ;;  %v1492_v13 = vpop.permute.xlu0 %1491  ;;  %4661 = vst [vmem:[#allocation8_spill] sm:$0xff] %v3266_v14  ;;  %vm1105_vm1 = vcmp.lt.s32.totalorder %v3266_v14, 13 }
 0x11a   : > { %v577_v20 = vadd.f32 %v2606_v19, %v3228_v26  ;;  %v568_v21 = vpop.f32.mrb[17].mxu0  ;;  %vm1586_vm3 = vcmp.eq.s32.totalorder %v3266_v14, %v1492_v13 }
 0x11b   : > { %v569_v22 = vadd.f32 %v3228_v26, %v568_v21  ;;  %v2607_v23 = vpop.f32.mrb[18].mxu0  ;;  %2648 = vmatprep.mubr.bf16.mxu1 %v669_v18 }
 0x11c   : > { %v649_v24 = vmax.f32 %v577_v20, 0.0  ;;  %v580_v25 = vadd.f32 %v2607_v23, %v3228_v26  ;;  %v571_v27 = vpop.f32.mrb[19].mxu0  ;;  %2649 = vmatmul.mubr.bf16.gmra.mrb[8].mxu1 %v670_v17 }
 0x11d   : > { %v647_v28 = vmax.f32 %v569_v22, 0.0  ;;  %v572_v29 = vadd.f32 %v3228_v26, %v571_v27  ;;  %v1498_v16 = vpop.permute.xlu0 %1497  ;;  %v1495_v27 = vpop.permute.xlu1 %1494 }
 0x11e   : > { %v650_v30 = vmax.f32 %v580_v25, 0.0  ;;  %vm1588_vm2 = vcmp.eq.s32.totalorder %v3266_v14, %v1498_v16  ;;  %vm1587_vm5 = vcmp.eq.s32.totalorder %v3266_v14, %v1495_v27 }
 0x11f   : > { %v648_v31 = vmax.f32 %v572_v29, 0.0 }
 0x120   : > { %v672_v32 = vpack.c.bf16 %v650_v30, %v649_v24 }
 0x121   : > { %v671_v33 = vpack.c.bf16 %v648_v31, %v647_v28  ;;  %v2610_v34 = vpop.f32.mrb[20].mxu0  ;;  %v1504_v13 = vpop.permute.xlu0 %1503 }
 0x122   : > { %v593_v35 = vadd.f32 %v2610_v34, %v3228_v26  ;;  %v584_v36 = vpop.f32.mrb[21].mxu0  ;;  %vm1590_vm6 = vcmp.eq.s32.totalorder %v3266_v14, %v1504_v13 }
 0x123   : > { %v585_v37 = vadd.f32 %v3228_v26, %v584_v36  ;;  %v2611_v38 = vpop.f32.mrb[22].mxu0  ;;  %2652 = vmatprep.mubr.bf16.mxu1 %v671_v33 }
 0x124   : > { %v653_v39 = vmax.f32 %v593_v35, 0.0  ;;  %v596_v40 = vadd.f32 %v2611_v38, %v3228_v26  ;;  %v587_v41 = vpop.f32.mrb[23].mxu0  ;;  %2653 = vmatmul.mubr.bf16.gmra.mrb[12].mxu1 %v672_v32  ;;  %v1501_v35 = vpop.permute.xlu1 %1500 }
 0x125   : > { %v651_v42 = vmax.f32 %v585_v37, 0.0  ;;  %v588_v43 = vadd.f32 %v3228_v26, %v587_v41  ;;  %vm1589_vm4 = vcmp.eq.s32.totalorder %v3266_v14, %v1501_v35 }
 0x126   : > { %v654_v44 = vmax.f32 %v596_v40, 0.0 }
 0x127   : > { %v652_v45 = vmax.f32 %v588_v43, 0.0 }
 0x128   : > { %v674_v46 = vpack.c.bf16 %v654_v44, %v653_v39 }
 0x129   : > { %v673_v47 = vpack.c.bf16 %v652_v45, %v651_v42  ;;  %v2614_v48 = vpop.f32.mrb[24].mxu0 }
 0x12a   : > { %v609_v49 = vadd.f32 %v2614_v48, %v3228_v26  ;;  %v600_v50 = vpop.f32.mrb[25].mxu0 }
 0x12b   : > { %v601_v51 = vadd.f32 %v3228_v26, %v600_v50  ;;  %v2615_v52 = vpop.f32.mrb[26].mxu0  ;;  %2656 = vmatprep.mubr.bf16.mxu1 %v673_v47 }
 0x12c   : > { %v657_v53 = vmax.f32 %v609_v49, 0.0  ;;  %v612_v54 = vadd.f32 %v2615_v52, %v3228_v26  ;;  %v603_v55 = vpop.f32.mrb[27].mxu0  ;;  %2657 = vmatmul.mubr.bf16.gmra.mrb[16].mxu1 %v674_v46 }
 0x12d   : > { %v655_v56 = vmax.f32 %v601_v51, 0.0  ;;  %v604_v57 = vadd.f32 %v3228_v26, %v603_v55 }
 0x12e   : > { %v658_v58 = vmax.f32 %v612_v54, 0.0 }
 0x12f   : > { %v656_v59 = vmax.f32 %v604_v57, 0.0 }
 0x130   : > { %v676_v60 = vpack.c.bf16 %v658_v58, %v657_v53 }
 0x131   : > { %v675_v61 = vpack.c.bf16 %v656_v59, %v655_v56  ;;  %v2618_v62 = vpop.f32.mrb[28].mxu0 }
 0x132   : > { %v625_v63 = vadd.f32 %v2618_v62, %v3228_v26  ;;  %v616_v0 = vpop.f32.mrb[29].mxu0 }
 0x133   : > { %v617_v1 = vadd.f32 %v3228_v26, %v616_v0  ;;  %v2619_v2 = vpop.f32.mrb[30].mxu0  ;;  %2660 = vmatprep.mubr.bf16.mxu1 %v675_v61 }
 0x134   : > { %v661_v3 = vmax.f32 %v625_v63, 0.0  ;;  %v628_v4 = vadd.f32 %v2619_v2, %v3228_v26  ;;  %v619_v5 = vpop.f32.mrb[31].mxu0  ;;  %2661 = vmatmul.mubr.bf16.gmra.mrb[20].mxu1 %v676_v60 }
 0x135   : > { %v659_v6 = vmax.f32 %v617_v1, 0.0  ;;  %v620_v7 = vadd.f32 %v3228_v26, %v619_v5 }
 0x136   : > { %v662_v8 = vmax.f32 %v628_v4, 0.0 }
 0x137   : > { %v660_v9 = vmax.f32 %v620_v7, 0.0 }
 0x138   : > { %v678_v10 = vpack.c.bf16 %v662_v8, %v661_v3 }
 0x139   : > { %v677_v11 = vpack.c.bf16 %v660_v9, %v659_v6 }
 0x13b   : > { %2664 = vmatprep.mubr.bf16.mxu1 %v677_v11 }
 0x13c   : > { %2665 = vmatmul.mubr.bf16.gmra.mrb[24].mxu1 %v678_v10 }
 0x1d7   : > { %v2638_v26 = vpop.f32.mrb[32].mxu0 }
 0x1d8   : > { %v793_v17 = vadd.f32 %v2638_v26, %v3271_v15  ;;  %v784_v18 = vpop.f32.mrb[33].mxu0 }
 0x1d9   : > { %v2639_v19 = vpop.f32.mrb[34].mxu0  ;;  %v785_v20 = vadd.f32 %v3271_v15, %v784_v18 }
 0x1da   : > { %v796_v21 = vadd.f32 %v2639_v19, %v3271_v15  ;;  %v787_v22 = vpop.f32.mrb[35].mxu0  ;;  %v1620_v23 = vsel %vm1588_vm2, %v793_v17, 0.0  ;;  %v3281_v24 = vsel %vm1105_vm1, %v793_v17, -1e+30 }
 0x1db   : > { %v788_v25 = vadd.f32 %v3271_v15, %v787_v22  ;;  %1654 = vadd.xlane.f32.xlu0 %v1620_v23  ;;  %1142 = vmax.xlane.f32.xlu1 %v3281_v24  ;;  %v3294_v31 = vsel %vm1105_vm1, %v785_v20, -1e+30  ;;  %v1618_v39 = vsel %vm1586_vm3, %v785_v20, 0.0  ;;  %v1507_v23 = vpop.permute.xlu1 %1506 }
 0x1dc   : > { %v2458_v28 = vpack.c.bf16 %v796_v21, %v793_v17  ;;  %v3290_v30 = vsel %vm1105_vm1, %v796_v21, -1e+30  ;;  %v1621_v45 = vsel %vm1589_vm4, %v796_v21, 0.0  ;;  %vm1591_vm7 = vcmp.eq.s32.totalorder %v3266_v14, %v1507_v23 }
 0x1dd   : > { %v2453_v29 = vpack.c.bf16 %v788_v25, %v785_v20  ;;  %v3339_v53 = vsel %vm1105_vm1, %v788_v25, -1e+30  ;;  %v1619_v59 = vsel %vm1587_vm5, %v788_v25, 0.0 }
 0x1de   : > { %2530 = vst [vmem:[%s3285_s22 + $0x8] sm:$0xff] %v2458_v28  }
 0x1df   : > { %2454 = vst [vmem:[%s3285_s22] sm:$0xff] %v2453_v29   ;;  %v2642_v32 = vpop.f32.mrb[0].mxu1  ;;  %1144 = vmax.xlane.f32.xlu1 %v3290_v30  ;;  %1138 = vmax.xlane.f32.xlu0 %v3294_v31 }
 0x1e0   : > { %v800_v33 = vpop.f32.mrb[1].mxu1  ;;  %v3301_v36 = vadd.f32 %v2642_v32, %v3271_v15 }
 0x1e1   : > { %v2643_v34 = vpop.f32.mrb[2].mxu1  ;;  %v3307_v40 = vadd.f32 %v3271_v15, %v800_v33 }
 0x1e2   : > { %v3304_v37 = vadd.f32 %v2643_v34, %v3271_v15  ;;  %v803_v38 = vpop.f32.mrb[3].mxu1  ;;  %v3376_v3 = vsel %vm1105_vm1, %v3301_v36, -1e+30 }
 0x1e3   : > { %v3310_v41 = vadd.f32 %v3271_v15, %v803_v38  ;;  %1650 = vadd.xlane.f32.xlu0 %v1618_v39  ;;  %v3399_v9 = vsel %vm1105_vm1, %v3307_v40, -1e+30  ;;  %v1622_v20 = vsel %vm1590_vm6, %v3307_v40, 0.0 }
 0x1e4   : > { %v2468_v42 = vpack.c.bf16 %v3304_v37, %v3301_v36  ;;  %v3318_v43 = vsel %vm1105_vm1, %v3304_v37, -1e+30 }
 0x1e5   : > { %v2463_v44 = vpack.c.bf16 %v3310_v41, %v3307_v40  ;;  %1152 = vmax.xlane.f32.xlu1 %v3318_v43  ;;  %v3327_v46 = vsel %vm1105_vm1, %v3310_v41, -1e+30  ;;  %v1623_v29 = vsel %vm1591_vm7, %v3310_v41, 0.0 }
 0x1e6   : > { %2532 = vst [vmem:[%s3285_s22 + $0x18] sm:$0xff] %v2468_v42  }
 0x1e7   : > { %2531 = vst [vmem:[%s3285_s22 + $0x10] sm:$0xff] %v2463_v44   ;;  %v2646_v47 = vpop.f32.mrb[4].mxu1  ;;  %1656 = vadd.xlane.f32.xlu0 %v1621_v45 }
 0x1e8   : > { %v816_v48 = vpop.f32.mrb[5].mxu1  ;;  %v3332_v50 = vadd.f32 %v2646_v47, %v3271_v15  ;;  %v3466_v47 = vpop.permute.xlu1 %1512 }
 0x1e9   : > { %v2647_v49 = vpop.f32.mrb[6].mxu1  ;;  %1148 = vmax.xlane.f32.xlu1 %v3327_v46  ;;  %v3342_v54 = vadd.f32 %v3271_v15, %v816_v48  ;;  %vm1593_vm9 = vcmp.eq.s32.totalorder %v3266_v14, %v3466_v47 }
 0x1ea   : > { %v3335_v51 = vadd.f32 %v2647_v49, %v3271_v15  ;;  %v819_v52 = vpop.f32.mrb[7].mxu1  ;;  %v3452_v41 = vsel %vm1105_vm1, %v3332_v50, -1e+30 }
 0x1eb   : > { %v3345_v55 = vadd.f32 %v3271_v15, %v819_v52  ;;  %1140 = vmax.xlane.f32.xlu0 %v3339_v53  ;;  %v3477_v52 = vsel %vm1105_vm1, %v3342_v54, -1e+30 }
 0x1ec   : > { %v2478_v56 = vpack.c.bf16 %v3335_v51, %v3332_v50  ;;  %v3354_v57 = vsel %vm1105_vm1, %v3335_v51, -1e+30 }
 0x1ed   : > { %v2473_v58 = vpack.c.bf16 %v3345_v55, %v3342_v54  ;;  %1160 = vmax.xlane.f32.xlu1 %v3354_v57  ;;  %v3363_v60 = vsel %vm1105_vm1, %v3345_v55, -1e+30 }
 0x1ee   : > { %2534 = vst [vmem:[%s3285_s22 + $0x28] sm:$0xff] %v2478_v56  }
 0x1ef   : > { %2533 = vst [vmem:[%s3285_s22 + $0x20] sm:$0xff] %v2473_v58   ;;  %v2650_v61 = vpop.f32.mrb[8].mxu1  ;;  %1652 = vadd.xlane.f32.xlu0 %v1619_v59 }
 0x1f0   : > { %v832_v62 = vpop.f32.mrb[9].mxu1  ;;  %v3368_v0 = vadd.f32 %v2650_v61, %v3271_v15 }
 0x1f1   : > { %v2651_v63 = vpop.f32.mrb[10].mxu1  ;;  %1156 = vmax.xlane.f32.xlu1 %v3363_v60  ;;  %v3379_v4 = vadd.f32 %v3271_v15, %v832_v62 }
 0x1f2   : > { %v3371_v1 = vadd.f32 %v2651_v63, %v3271_v15  ;;  %v835_v2 = vpop.f32.mrb[11].mxu1  ;;  %v3490_v63 = vpop.permute.xlu1 %1518 }
 0x1f3   : > { %v3382_v5 = vadd.f32 %v3271_v15, %v835_v2  ;;  %1150 = vmax.xlane.f32.xlu0 %v3376_v3  ;;  %vm1595_vm11 = vcmp.eq.s32.totalorder %v3266_v14, %v3490_v63 }
 0x1f4   : > { %v2488_v6 = vpack.c.bf16 %v3371_v1, %v3368_v0  ;;  %v3390_v7 = vsel %vm1105_vm1, %v3371_v1, -1e+30 }
 0x1f5   : > { %v2483_v8 = vpack.c.bf16 %v3382_v5, %v3379_v4  ;;  %1168 = vmax.xlane.f32.xlu1 %v3390_v7  ;;  %v3404_v10 = vsel %vm1105_vm1, %v3382_v5, -1e+30 }
 0x1f6   : > { %2536 = vst [vmem:[%s3285_s22 + $0x38] sm:$0xff] %v2488_v6  }
 0x1f7   : > { %2535 = vst [vmem:[%s3285_s22 + $0x30] sm:$0xff] %v2483_v8   ;;  %v2654_v11 = vpop.f32.mrb[12].mxu1  ;;  %1146 = vmax.xlane.f32.xlu0 %v3399_v9  ;;  %v3498_v8 = vsel %vm1105_vm1, %v3368_v0, -1e+30 }
 0x1f8   : > { %v848_v26 = vpop.f32.mrb[13].mxu1  ;;  %v3411_v17 = vadd.f32 %v2654_v11, %v3271_v15 }
 0x1f9   : > { %v2655_v16 = vpop.f32.mrb[14].mxu1  ;;  %1164 = vmax.xlane.f32.xlu1 %v3404_v10  ;;  %v3418_v21 = vadd.f32 %v3271_v15, %v848_v26 }
 0x1fa   : > { %v3414_v18 = vadd.f32 %v2655_v16, %v3271_v15  ;;  %v851_v19 = vpop.f32.mrb[15].mxu1 }
 0x1fb   : > { %v3421_v22 = vadd.f32 %v3271_v15, %v851_v19  ;;  %1658 = vadd.xlane.f32.xlu0 %v1622_v20  ;;  %v3521_v20 = vsel %vm1105_vm1, %v3379_v4, -1e+30 }
 0x1fc   : > { %v2498_v25 = vpack.c.bf16 %v3414_v18, %v3411_v17  ;;  %v3428_v27 = vsel %vm1105_vm1, %v3414_v18, -1e+30 }
 0x1fd   : > { %v2493_v28 = vpack.c.bf16 %v3421_v22, %v3418_v21  ;;  %1176 = vmax.xlane.f32.xlu1 %v3428_v27  ;;  %v3439_v32 = vsel %vm1105_vm1, %v3421_v22, -1e+30 }
 0x1fe   : > { %2538 = vst [vmem:[%s3285_s22 + $0x48] sm:$0xff] %v2498_v25  }
 0x1ff   : > { %2537 = vst [vmem:[%s3285_s22 + $0x40] sm:$0xff] %v2493_v28   ;;  %v2658_v33 = vpop.f32.mrb[16].mxu1  ;;  %1660 = vadd.xlane.f32.xlu0 %v1623_v29  ;;  %v3530_v28 = vpop.permute.xlu1 %1524 }
 0x200   : > { %v3443_v34 = vadd.f32 %v2658_v33, %v3271_v15  ;;  %v864_v35 = vpop.f32.mrb[17].mxu1  ;;  %vm1597_vm13 = vcmp.eq.s32.totalorder %v3266_v14, %v3530_v28 }
 0x201   : > { %v2659_v38 = vpop.f32.mrb[18].mxu1  ;;  %1172 = vmax.xlane.f32.xlu1 %v3439_v32  ;;  %v3460_v44 = vadd.f32 %v3271_v15, %v864_v35  ;;  %v3538_v35 = vsel %vm1105_vm1, %v3411_v17, -1e+30 }
 0x202   : > { %v3447_v39 = vadd.f32 %v2659_v38, %v3271_v15  ;;  %v867_v40 = vpop.f32.mrb[19].mxu1  ;;  %v3457_v42 = vsel %vm1105_vm1, %v3443_v34, -1e+30 }
 0x203   : > { %v3463_v45 = vadd.f32 %v3271_v15, %v867_v40  ;;  %1158 = vmax.xlane.f32.xlu0 %v3452_v41  ;;  %v3482_v56 = vsel %vm1105_vm1, %v3460_v44, -1e+30 }
 0x204   : > { %v2508_v48 = vpack.c.bf16 %v3447_v39, %v3443_v34 }
 0x205   : > { %v2503_v49 = vpack.c.bf16 %v3463_v45, %v3460_v44  ;;  %1182 = vmax.xlane.f32.xlu1 %v3457_v42 }
 0x206   : > { %2540 = vst [vmem:[%s3285_s22 + $0x58] sm:$0xff] %v2508_v48  }
 0x207   : > { %2539 = vst [vmem:[%s3285_s22 + $0x50] sm:$0xff] %v2503_v49   ;;  %v2662_v58 = vpop.f32.mrb[20].mxu1  ;;  %1154 = vmax.xlane.f32.xlu0 %v3477_v52 }
 0x208   : > { %v3487_v59 = vadd.f32 %v2662_v58, %v3271_v15  ;;  %v880_v61 = vpop.f32.mrb[21].mxu1 }
 0x209   : > { %v2663_v62 = vpop.f32.mrb[22].mxu1  ;;  %1178 = vmax.xlane.f32.xlu1 %v3482_v56  ;;  %v3506_v13 = vadd.f32 %v3271_v15, %v880_v61 }
 0x20a   : > { %4662 = vst [vmem:[#allocation9_spill] sm:$0xff] %v3487_v59  ;;  %v3493_v2 = vadd.f32 %v2663_v62, %v3271_v15  ;;  %v883_v6 = vpop.f32.mrb[23].mxu1  ;;  %v3503_v11 = vsel %vm1105_vm1, %v3487_v59, -1e+30 }
 0x20b   : > { %4664 = vst [vmem:[#allocation11_spill] sm:$0xff] %v3506_v13  ;;  %v3509_v26 = vadd.f32 %v3271_v15, %v883_v6  ;;  %1166 = vmax.xlane.f32.xlu0 %v3498_v8  ;;  %v3526_v23 = vsel %vm1105_vm1, %v3506_v13, -1e+30  ;;  %v3561_v6 = vsel %vm1105_vm1, %v3418_v21, -1e+30 }
 0x20c   : > { %4663 = vst [vmem:[#allocation10_spill] sm:$0xff] %v3493_v2  ;;  %v2518_v16 = vpack.c.bf16 %v3493_v2, %v3487_v59 }
 0x20d   : > { %4665 = vst [vmem:[#allocation12_spill] sm:$0xff] %v3509_v26  ;;  %v2513_v19 = vpack.c.bf16 %v3509_v26, %v3506_v13  ;;  %1190 = vmax.xlane.f32.xlu1 %v3503_v11 }
 0x20e   : > { %2542 = vst [vmem:[%s3285_s22 + $0x68] sm:$0xff] %v2518_v16  }
 0x20f   : > { %2541 = vst [vmem:[%s3285_s22 + $0x60] sm:$0xff] %v2513_v19   ;;  %v2666_v25 = vpop.f32.mrb[24].mxu1  ;;  %1162 = vmax.xlane.f32.xlu0 %v3521_v20  ;;  %v3566_v19 = vpop.permute.xlu1 %1530 }
 0x210   : > { %v3533_v29 = vadd.f32 %v2666_v25, %v3271_v15  ;;  %v896_v33 = vpop.f32.mrb[25].mxu1  ;;  %v3579_v25 = vsel %vm1105_vm1, %v3447_v39, -1e+30 }
 0x211   : > { %v2667_v38 = vpop.f32.mrb[26].mxu1  ;;  %1186 = vmax.xlane.f32.xlu1 %v3526_v23  ;;  %v3550_v58 = vadd.f32 %v3271_v15, %v896_v33 }
 0x212   : > { %4666 = vst [vmem:[#allocation13_spill] sm:$0xff] %v3533_v29  ;;  %v3542_v40 = vadd.f32 %v2667_v38, %v3271_v15  ;;  %v899_v48 = vpop.f32.mrb[27].mxu1  ;;  %v3547_v49 = vsel %vm1105_vm1, %v3533_v29, -1e+30  ;;  %v3588_v38 = vsel %vm1105_vm1, %v3463_v45, -1e+30 }
 0x213   : > { %4668 = vst [vmem:[#allocation15_spill] sm:$0xff] %v3550_v58  ;;  %v3553_v61 = vadd.f32 %v3271_v15, %v899_v48  ;;  %1174 = vmax.xlane.f32.xlu0 %v3538_v35  ;;  %v3572_v15 = vsel %vm1105_vm1, %v3550_v58, -1e+30  ;;  %v3583_v33 = vpop.permute.xlu1 %1533  ;;  %v3594_v48 = vsel %vm1105_vm1, %v3493_v2, -1e+30 }
 0x214   : > { %4667 = vst [vmem:[#allocation14_spill] sm:$0xff] %v3542_v40  ;;  %v2528_v62 = vpack.c.bf16 %v3542_v40, %v3533_v29  ;;  %4670 = vst [vmem:[#allocation17_spill] sm:$0xff] %v3572_v15  ;;  %v3610_v29 = vsel %vm1105_vm1, %v3542_v40, -1e+30  ;;  %v1625_v40 = vsel %vm1593_vm9, %v3304_v37, 0.0 }
 0x215   : > { %4669 = vst [vmem:[#allocation16_spill] sm:$0xff] %v3553_v61  ;;  %v2523_v16 = vpack.c.bf16 %v3553_v61, %v3550_v58  ;;  %1198 = vmax.xlane.f32.xlu1 %v3547_v49  ;;  %4671 = vst [vmem:[#allocation18_spill] sm:$0xff] %v3610_v29  ;;  %v3616_v2 = vsel %vm1105_vm1, %v3553_v61, -1e+30 }
 0x216   : > { %2544 = vst [vmem:[%s3285_s22 + $0x78] sm:$0xff] %v2528_v62   ;;  %4672 = vst [vmem:[#allocation19_spill] sm:$0xff] %v3616_v2 }
 0x217   : > { %2543 = vst [vmem:[%s3285_s22 + $0x70] sm:$0xff] %v2523_v16   ;;  %1170 = vmax.xlane.f32.xlu0 %v3561_v6  ;;  %v3596_v62 = vpop.permute.xlu1 %1536  ;;  %v3602_v16 = vsel %vm1105_vm1, %v3509_v26, -1e+30  ;;  %v1510_v26 = vpop.permute.xlu0 %1509 }
 0x218   : > { %vm1592_vm8 = vcmp.eq.s32.totalorder %v3266_v14, %v1510_v26 }
 0x219   : > { %1194 = vmax.xlane.f32.xlu1 %v3572_v15  ;;  %v1624_v59 = vsel %vm1592_vm8, %v3301_v36, 0.0  ;;  %v1627_v36 = vsel %vm1595_vm11, %v3345_v55, 0.0  ;;  %vm4617_vm8 = vcmask 7168  }
 0x21b   : > { %1184 = vmax.xlane.f32.xlu0 %v3579_v25  ;;  %v3605_v12 = vpop.permute.xlu1 %1539  ;;  %v1516_v61 = vpop.permute.xlu0 %1515 }
 0x21c   : > { %vm1594_vm10 = vcmp.eq.s32.totalorder %v3266_v14, %v1516_v61 }
 0x21f   : > { %1180 = vmax.xlane.f32.xlu0 %v3588_v38  ;;  %v3618_v58 = vpop.permute.xlu1 %1545 }
 0x223   : > { %1192 = vmax.xlane.f32.xlu0 %v3594_v48  ;;  %v3623_v13 = vpop.permute.xlu1 %1548 }
 0x227   : > { %1188 = vmax.xlane.f32.xlu0 %v3602_v16 }
 0x22b   : > { %1200 = vmax.xlane.f32.xlu0 %v3610_v29  ;;  %v3629_v29 = vpop.permute.xlu1 %1551 }
 0x22f   : > { %1196 = vmax.xlane.f32.xlu0 %v3616_v2  ;;  %v1626_v2 = vsel %vm1594_vm10, %v3342_v54, 0.0  ;;  %v3635_v26 = vpop.permute.xlu1 %1554 }
 0x233   : > { %1662 = vadd.xlane.f32.xlu0 %v1624_v59  ;;  %v1522_v59 = vpop.permute.xlu0 %1521  ;;  %v3641_v54 = vpop.permute.xlu1 %1557 }
 0x234   : > { %vm1596_vm12 = vcmp.eq.s32.totalorder %v3266_v14, %v1522_v59 }
 0x235   : > { %v1628_v37 = vsel %vm1596_vm12, %v3332_v50, 0.0 }
 0x237   : > { %1664 = vadd.xlane.f32.xlu0 %v1625_v40  ;;  %v1528_v47 = vpop.permute.xlu0 %1527  ;;  %v3648_v40 = vpop.permute.xlu1 %1563 }
 0x238   : > { %vm1598_vm14 = vcmp.eq.s32.totalorder %v3266_v14, %v1528_v47 }
 0x239   : > { %v1630_v55 = vsel %vm1598_vm14, %v3379_v4, 0.0 }
 0x23b   : > { %1666 = vadd.xlane.f32.xlu0 %v1626_v2  ;;  %v1629_v2 = vsel %vm1597_vm13, %v3335_v51, 0.0  ;;  %v3646_v63 = vpop.permute.xlu0 %1542  ;;  %v3652_v61 = vpop.permute.xlu1 %1569 }
 0x23c   : > { %4673 = vst [vmem:[#allocation20_spill] sm:$0xff] %v3652_v61 }
 0x23f   : > { %1668 = vadd.xlane.f32.xlu0 %v1627_v36  ;;  %v3650_v50 = vpop.permute.xlu0 %1560  ;;  %v3656_v36 = vpop.permute.xlu1 %1575 }
 0x240   : > { %4675 = vst [vmem:[#allocation22_spill] sm:$0xff] %v3656_v36 }
 0x243   : > { %1670 = vadd.xlane.f32.xlu0 %v1628_v37  ;;  %v3654_v28 = vpop.permute.xlu0 %1566  ;;  %v3660_v51 = vpop.permute.xlu1 %1578 }
 0x244   : > { %4674 = vst [vmem:[#allocation21_spill] sm:$0xff] %v3654_v28  ;;  %4677 = vst [vmem:[#allocation24_spill] sm:$0xff] %v3660_v51 }
 0x247   : > { %1672 = vadd.xlane.f32.xlu0 %v1629_v2  ;;  %v3658_v59 = vpop.permute.xlu0 %1572  ;;  %v3664_v4 = vpop.permute.xlu1 %1584 }
 0x248   : > { %4676 = vst [vmem:[#allocation23_spill] sm:$0xff] %v3658_v59  ;;  %4679 = vst [vmem:[#allocation26_spill] sm:$0xff] %v3664_v4 }
 0x24b   : > { %1674 = vadd.xlane.f32.xlu0 %v1630_v55  ;;  %v3662_v37 = vpop.permute.xlu0 %1581 }
 0x24c   : > { %4678 = vst [vmem:[#allocation25_spill] sm:$0xff] %v3662_v37 }
 0x268   : > { %v3666_v47 = vpop.xlane.xlu0 %1654  ;;  %v3668_v2 = vpop.xlane.xlu1 %1142 }
 0x269   : > { %4680 = vst [vmem:[#allocation27_spill] sm:$0xff] %v3666_v47  ;;  %4681 = vst [vmem:[#allocation28_spill] sm:$0xff] %v3668_v2  ;;  %v1204_v55 = vsub.f32 %v3281_v24, %v3668_v2 }
 0x26b   : > { %v1238_v61 = vmul.f32 1.442695, %v1204_v55 }
 0x26c   : > { %v3672_v15 = vpop.xlane.xlu1 %1144  ;;  %v3674_v28 = vpop.xlane.xlu0 %1138 }
 0x26d   : > { %4682 = vst [vmem:[#allocation29_spill] sm:$0xff] %v3672_v15  ;;  %2746 = vpow2.f32 %v1238_v61  ;;  %v1205_v51 = vsub.f32 %v3290_v30, %v3672_v15  ;;  %v1202_v59 = vsub.f32 %v3294_v31, %v3674_v28 }
 0x26f   : > { %v1234_v4 = vmul.f32 1.442695, %v1202_v59  ;;  %v1240_v37 = vmul.f32 1.442695, %v1205_v51 }
 0x270   : > { %v3680_v47 = vpop.xlane.xlu0 %1650 }
 0x271   : > { %4683 = vst [vmem:[#allocation30_spill] sm:$0xff] %v3680_v47  ;;  %2748 = vpow2.f32 %v1234_v4 }
 0x272   : > { %2750 = vpow2.f32 %v1240_v37  ;;  %v3694_v4 = vpop.xlane.xlu1 %1152 }
 0x273   : > { %4685 = vst [vmem:[#allocation32_spill] sm:$0xff] %v3694_v4 }
 0x274   : > { %v3682_v36 = vpop.xlane.xlu0 %1656 }
 0x275   : > { %4684 = vst [vmem:[#allocation31_spill] sm:$0xff] %v3682_v36 }
 0x277   : > { %v2747_v24 = vpop.eup %2746 }
 0x278   : > { %v3684_v55 = vpop.xlane.xlu0 %1140  ;;  %v1300_v61 = vsel %vm1105_vm1, %v2747_v24, 0.0 }
 0x279   : > { %v1203_v30 = vsub.f32 %v3339_v53, %v3684_v55  ;;  %1334 = vadd.xlane.f32.xlu1 %v1300_v61  ;;  %v1209_v61 = vsub.f32 %v3318_v43, %v3694_v4 }
 0x27b   : > { %v1236_v15 = vmul.f32 1.442695, %v1203_v30  ;;  %v2749_v31 = vpop.eup %2748  ;;  %v3704_v30 = vpop.xlane.xlu1 %1148  ;;  %v1248_v2 = vmul.f32 1.442695, %v1209_v61 }
 0x27c   : > { %v3690_v59 = vpop.xlane.xlu0 %1652  ;;  %v1298_v51 = vsel %vm1105_vm1, %v2749_v31, 0.0  ;;  %v2751_v37 = vpop.eup %2750  ;;  %4687 = vst [vmem:[#allocation34_spill] sm:$0xff] %v3704_v30 }
 0x27d   : > { %2752 = vpow2.f32 %v1236_v15  ;;  %1330 = vadd.xlane.f32.xlu0 %v1298_v51  ;;  %v1301_v53 = vsel %vm1105_vm1, %v2751_v37, 0.0 }
 0x280   : > { %v3696_v36 = vpop.xlane.xlu0 %1150 }
 0x281   : > { %4686 = vst [vmem:[#allocation33_spill] sm:$0xff] %v3696_v36  ;;  %v1208_v24 = vsub.f32 %v3376_v3, %v3696_v36  ;;  %1336 = vadd.xlane.f32.xlu0 %v1301_v53  ;;  %v1207_v3 = vsub.f32 %v3327_v46, %v3704_v30 }
 0x283   : > { %v1246_v15 = vmul.f32 1.442695, %v1208_v24  ;;  %v3716_v24 = vpop.xlane.xlu1 %1160  ;;  %v1244_v53 = vmul.f32 1.442695, %v1207_v3  ;;  %v4694_v3 = vlaneseq }
 0x284   : > { %v3706_v31 = vpop.xlane.xlu0 %1146  ;;  %4690 = vst [vmem:[#allocation37_spill] sm:$0xff] %v3716_v24  ;;  %v1213_v46 = vsub.f32 %v3354_v57, %v3716_v24 }
 0x285   : > { %4688 = vst [vmem:[#allocation35_spill] sm:$0xff] %v3706_v31  ;;  %2754 = vpow2.f32 %v1246_v15  ;;  %v1206_v51 = vsub.f32 %v3399_v9, %v3706_v31 }
 0x286   : > { %v1256_v4 = vmul.f32 1.442695, %v1213_v46 }
 0x287   : > { %v2753_v47 = vpop.eup %2752  ;;  %v1242_v36 = vmul.f32 1.442695, %v1206_v51  ;;  %v3722_v61 = vpop.xlane.xlu1 %1156 }
 0x288   : > { %v3712_v37 = vpop.xlane.xlu0 %1658  ;;  %v1299_v43 = vsel %vm1105_vm1, %v2753_v47, 0.0  ;;  %4692 = vst [vmem:[#allocation39_spill] sm:$0xff] %v3722_v61 }
 0x289   : > { %4689 = vst [vmem:[#allocation36_spill] sm:$0xff] %v3712_v37  ;;  %2756 = vpow2.f32 %v1242_v36  ;;  %1332 = vadd.xlane.f32.xlu1 %v1299_v43  ;;  %v3731_v43 = vshrl.u32 %v4694_v3, 7 }
 0x28a   : > { %2758 = vpow2.f32 %v1248_v2 }
 0x28b   : > { %2760 = vpow2.f32 %v1244_v53  ;;  %4695 = vst [vmem:[#allocation41_spill] sm:$0xff] %v3731_v43  ;;  %v1211_v53 = vsub.f32 %v3363_v60, %v3722_v61  ;;  %v1753_v31 = vadd.s32 40, %v3731_v43 }
 0x28c   : > { %v3718_v15 = vpop.xlane.xlu0 %1660 }
 0x28d   : > { %4691 = vst [vmem:[#allocation38_spill] sm:$0xff] %v3718_v15  ;;  %v1252_v60 = vmul.f32 1.442695, %v1211_v53 }
 0x28f   : > { %v2755_v9 = vpop.eup %2754 }
 0x290   : > { %v3724_v51 = vpop.xlane.xlu0 %1158  ;;  %v1304_v36 = vsel %vm1105_vm1, %v2755_v9, 0.0  ;;  %v1749_v9 = vadd.s32 8, %v3731_v43 }
 0x291   : > { %4693 = vst [vmem:[#allocation40_spill] sm:$0xff] %v3724_v51  ;;  %v1212_v47 = vsub.f32 %v3452_v41, %v3724_v51  ;;  %1342 = vadd.xlane.f32.xlu0 %v1304_v36  ;;  %v3743_v36 = vpop.xlane.xlu1 %1168 }
 0x292   : > { %4697 = vst [vmem:[#allocation43_spill] sm:$0xff] %v3743_v36  ;;  %v1217_v53 = vsub.f32 %v3390_v7, %v3743_v36  ;;  %v2875_v7 = vld [vmem:[%s3191_s16] sm:$0xff] }
 0x293   : > { %v2757_v2 = vpop.eup %2756  ;;  %v1254_v57 = vmul.f32 1.442695, %v1212_v47  ;;  %v3745_v47 = vstv %s2373_s23  ;;  %vm1813_vm3 = vcmp.ge.s32.totalorder %v2875_v7, 0  ;;  %v4605_v7 = vmov 0.0  }
 0x294   : > { %v3735_v24 = vpop.xlane.xlu0 %1154  ;;  %v1302_v15 = vsel %vm1105_vm1, %v2757_v2, 0.0  ;;  %v2759_v37 = vpop.eup %2758  ;;  %v1264_v36 = vmul.f32 1.442695, %v1217_v53 }
 0x295   : > { %4696 = vst [vmem:[#allocation42_spill] sm:$0xff] %v3735_v24  ;;  %2762 = vpow2.f32 %v1254_v57  ;;  %v1210_v41 = vsub.f32 %v3477_v52, %v3735_v24  ;;  %1338 = vadd.xlane.f32.xlu1 %v1302_v15  ;;  %v1305_v2 = vsel %vm1105_vm1, %v2759_v37, 0.0  ;;  %v2761_v51 = vpop.eup %2760  ;;  %v1782_v57 = vadd.s32 %v3745_v47, %v1749_v9  ;;  %v2874_v37 = vld [vmem:[%s3191_s16 + $0x8] sm:$0xff]  ;;  %v3760_v61 = vpop.xlane.xlu1 %1164 }
 0x296   : > { %2764 = vpow2.f32 %v1256_v4  ;;  %v1781_v4 = vadd.s32 %v3745_v47, %v3731_v43  ;;  %v1750_v15 = vadd.s32 16, %v3731_v43  ;;  %vm1814_vm15 = vcmp.ge.s32.totalorder %v2874_v37, 0  ;;  %4699 = vst [vmem:[#allocation45_spill] sm:$0xff] %v3760_v61 }
 0x297   : > { %v1250_v46 = vmul.f32 1.442695, %v1210_v41  ;;  %vm1846_vm0 = vcmp.lt.s32.totalorder %v1782_v57, 1000 }
 0x298   : > { %v3747_v3 = vpop.xlane.xlu0 %1166  ;;  %vm1845_vm2 = vcmp.lt.s32.totalorder %v1781_v4, 1000  ;;  %vm3774_vm4 = vmand %vm1814_vm15, %vm1846_vm0  ;;  %vm1599_vm15 = vcmp.eq.s32.totalorder %v3266_v14, %v3566_v19 }
 0x299   : > { %4698 = vst [vmem:[#allocation44_spill] sm:$0xff] %v3747_v3  ;;  %2766 = vpow2.f32 %v1250_v46  ;;  %v1216_v52 = vsub.f32 %v3498_v8, %v3747_v3  ;;  %1344 = vadd.xlane.f32.xlu1 %v1305_v2  ;;  %v1303_v8 = vsel %vm1105_vm1, %v2761_v51, 0.0  ;;  %v1751_v46 = vadd.s32 24, %v3731_v43  ;;  %vm3787_vm5 = vmand %vm1813_vm3, %vm1845_vm2 }
 0x29a   : > { %2768 = vpow2.f32 %v1252_v60  ;;  %v1783_v2 = vadd.s32 %v3745_v47, %v1750_v15  ;;  %v1215_v3 = vsub.f32 %v3404_v10, %v3760_v61  ;;  %v2375_v15 = vsel %vm3774_vm4, 1.0, %v4605_v7  ;;  %v3796_v61 = vpop.xlane.xlu1 %1176 }
 0x29b   : > { %v1262_v41 = vmul.f32 1.442695, %v1216_v52  ;;  %v1784_v53 = vadd.s32 %v3745_v47, %v1751_v46  ;;  %v4704_v10 = vmov 0  ;;  %v2374_v37 = vsel %vm3787_vm5, 1.0, %v4605_v7 }
 0x29c   : > { %v3762_v9 = vpop.xlane.xlu0 %1162  ;;  %v4705_v10 = vsel %vm3787_vm5, 4294967295, %v4704_v10  ;;  %vm1847_vm7 = vcmp.lt.s32.totalorder %v1783_v2, 1000  ;;  %v1260_v4 = vmul.f32 1.442695, %v1215_v3  ;;  %v2079_v30 = vsel %vm4617_vm8, %v2375_v15, 0.0  ;;  %v2877_v3 = vld [vmem:[%s3191_s16 + $0x18] sm:$0xff] }
 0x29d   : > { %4700 = vst [vmem:[#allocation46_spill] sm:$0xff] %v3762_v9  ;;  %2770 = vpow2.f32 %v1262_v41  ;;  %v1214_v60 = vsub.f32 %v3521_v20, %v3762_v9  ;;  %1340 = vadd.xlane.f32.xlu1 %v1303_v8  ;;  %4706 = vst [vmem:[#allocation48_spill] sm:$0xff] %v4705_v10  ;;  %vm1816_vm10 = vcmp.ge.s32.totalorder %v2877_v3, 0  ;;  %vm1848_vm11 = vcmp.lt.s32.totalorder %v1784_v53, 1000 }
 0x29e   : > { %v3822_v10 = vpop.xlane.xlu1 %1172  ;;  %vm3828_vm12 = vmand %vm1816_vm10, %vm1848_vm11  ;;  %v1631_v3 = vsel %vm1599_vm15, %v3382_v5, 0.0 }
 0x29f   : > { %v2763_v52 = vpop.eup %2762  ;;  %v1258_v51 = vmul.f32 1.442695, %v1214_v60  ;;  %v2876_v60 = vld [vmem:[%s3191_s16 + $0x10] sm:$0xff] }
 0x2a0   : > { %v3778_v41 = vpop.xlane.xlu0 %1174  ;;  %v1308_v20 = vsel %vm1105_vm1, %v2763_v52, 0.0  ;;  %v2765_v8 = vpop.eup %2764  ;;  %vm1815_vm6 = vcmp.ge.s32.totalorder %v2876_v60, 0  ;;  %v1752_v52 = vadd.s32 32, %v3731_v43 }
 0x2a1   : > { %4703 = vst [vmem:[#allocation47_spill] sm:$0xff] %v3778_v41  ;;  %2772 = vpow2.f32 %v1258_v51  ;;  %1350 = vadd.xlane.f32.xlu1 %v1308_v20  ;;  %v1220_v9 = vsub.f32 %v3538_v35, %v3778_v41  ;;  %v1309_v20 = vsel %vm1105_vm1, %v2765_v8, 0.0  ;;  %vm3811_vm9 = vmand %vm1815_vm6, %vm1847_vm7  ;;  %v4709_v8 = vmov 0.0  }
 0x2a2   : > { %2774 = vpow2.f32 %v1264_v36  ;;  %v2078_v36 = vsel %vm4617_vm8, %v2374_v37, 0.0  ;;  %v1785_v15 = vadd.s32 %v3745_v47, %v1752_v52  ;;  %v1786_v52 = vadd.s32 %v3745_v47, %v1753_v31 }
 0x2a3   : > { %v2767_v46 = vpop.eup %2766  ;;  %2776 = vpow2.f32 %v1260_v4  ;;  %v1270_v2 = vmul.f32 1.442695, %v1220_v9  ;;  %v2080_v60 = vadd.f32 %v2079_v30, %v2078_v36  ;;  %v2878_v30 = vld [vmem:[%s3191_s16 + $0x20] sm:$0xff]  ;;  %v1221_v4 = vsub.f32 %v3428_v27, %v3796_v61  ;;  %v2879_v27 = vld [vmem:[%s3191_s16 + $0x28] sm:$0xff] }
 0x2a4   : > { %v3800_v51 = vpop.xlane.xlu0 %1170  ;;  %v1306_v7 = vsel %vm1105_vm1, %v2767_v46, 0.0  ;;  %v2769_v24 = vpop.eup %2768  ;;  %v2376_v46 = vsel %vm3811_vm9, 1.0, %v4709_v8  ;;  %vm1817_vm13 = vcmp.ge.s32.totalorder %v2878_v30, 0  ;;  %vm1849_vm14 = vcmp.lt.s32.totalorder %v1785_v15, 1000 }
 0x2a5   : > { %1352 = vadd.xlane.f32.xlu1 %v1309_v20  ;;  %1346 = vadd.xlane.f32.xlu0 %v1306_v7  ;;  %v1218_v37 = vsub.f32 %v3561_v6, %v3800_v51  ;;  %v1307_v7 = vsel %vm1105_vm1, %v2769_v24, 0.0  ;;  %v2081_v9 = vsel %vm4617_vm8, %v2376_v46, 0.0  ;;  %v2377_v6 = vsel %vm3828_vm12, 1.0, %v4709_v8  ;;  %vm3848_vm0 = vmand %vm1817_vm13, %vm1849_vm14 }
 0x2a6   : > { %v1754_v24 = vadd.s32 48, %v3731_v43  ;;  %2778 = vpow2.f32 %v1270_v2  ;;  %v2082_v36 = vadd.f32 %v2081_v9, %v2080_v60  ;;  %v2083_v15 = vsel %vm4617_vm8, %v2377_v6, 0.0  ;;  %v3857_v2 = vpop.xlane.xlu1 %1182 }
 0x2a7   : > { %v2771_v41 = vpop.eup %2770  ;;  %v1266_v31 = vmul.f32 1.442695, %v1218_v37  ;;  %vm1818_vm2 = vcmp.ge.s32.totalorder %v2879_v27, 0  ;;  %vm1850_vm3 = vcmp.lt.s32.totalorder %v1786_v52, 1000  ;;  %v2378_v5 = vsel %vm3848_vm0, 1.0, %v4709_v8 }
 0x2a8   : > { %v1312_v53 = vsel %vm1105_vm1, %v2771_v41, 0.0  ;;  %v1787_v19 = vadd.s32 %v3745_v47, %v1754_v24  ;;  %v1272_v37 = vmul.f32 1.442695, %v1221_v4  ;;  %v1219_v60 = vsub.f32 %v3439_v32, %v3822_v10  ;;  %vm3866_vm7 = vmand %vm1818_vm2, %vm1850_vm3 }
 0x2a9   : > { %1348 = vadd.xlane.f32.xlu0 %v1307_v7  ;;  %1358 = vadd.xlane.f32.xlu1 %v1312_v53  ;;  %v1755_v53 = vadd.s32 56, %v3731_v43  ;;  %2780 = vpow2.f32 %v1266_v31  ;;  %vm1600_vm6 = vcmp.eq.s32.totalorder %v3266_v14, %v3583_v33  ;;  %v2084_v9 = vadd.f32 %v2083_v15, %v2082_v36 }
 0x2aa   : > { %v1632_v52 = vsel %vm1600_vm6, %v3368_v0, 0.0  ;;  %v2379_v32 = vsel %vm3866_vm7, 1.0, %v4709_v8  ;;  %v2880_v0 = vld [vmem:[%s3191_s16 + $0x30] sm:$0xff]  ;;  %vm1851_vm11 = vcmp.lt.s32.totalorder %v1787_v19, 1000  ;;  %v1756_v33 = vadd.s32 64, %v3731_v43 }
 0x2ab   : > { %v2773_v41 = vpop.eup %2772  ;;  %v1788_v4 = vadd.s32 %v3745_v47, %v1755_v53  ;;  %vm1819_vm10 = vcmp.ge.s32.totalorder %v2880_v0, 0  ;;  %2782 = vpow2.f32 %v1272_v37  ;;  %v1268_v31 = vmul.f32 1.442695, %v1219_v60  ;;  %v3899_v60 = vpop.xlane.xlu0 %1184 }
 0x2ac   : > { %v1310_v46 = vsel %vm1105_vm1, %v2773_v41, 0.0  ;;  %v2775_v7 = vpop.eup %2774  ;;  %v1224_v36 = vsub.f32 %v3457_v42, %v3857_v2  ;;  %vm1601_vm13 = vcmp.eq.s32.totalorder %v3266_v14, %v3596_v62  ;;  %vm3890_vm2 = vmand %vm1819_vm10, %vm1851_vm11  ;;  %v1757_v62 = vadd.s32 72, %v3731_v43 }
 0x2ad   : > { %1676 = vadd.xlane.f32.xlu0 %v1631_v3  ;;  %1354 = vadd.xlane.f32.xlu1 %v1310_v46  ;;  %v1313_v6 = vsel %vm1105_vm1, %v2775_v7, 0.0  ;;  %v2777_v41 = vpop.eup %2776  ;;  %v2085_v3 = vsel %vm4617_vm8, %v2378_v5, 0.0  ;;  %v3881_v7 = vpop.xlane.xlu1 %1178  ;;  %v1633_v15 = vsel %vm1601_vm13, %v3371_v1, 0.0  ;;  %v2087_v5 = vsel %vm4617_vm8, %v2379_v32, 0.0 }
 0x2ae   : > { %v2086_v46 = vadd.f32 %v2085_v3, %v2084_v9  ;;  %v1311_v53 = vsel %vm1105_vm1, %v2777_v41, 0.0  ;;  %vm1852_vm15 = vcmp.lt.s32.totalorder %v1788_v4, 1000  ;;  %v2380_v1 = vsel %vm3890_vm2, 1.0, %v4709_v8 }
 0x2af   : > { %v1789_v37 = vadd.s32 %v3745_v47, %v1756_v33  ;;  %vm1602_vm3 = vcmp.eq.s32.totalorder %v3266_v14, %v3605_v12  ;;  %2784 = vpow2.f32 %v1268_v31  ;;  %v1278_v19 = vmul.f32 1.442695, %v1224_v36  ;;  %v2882_v33 = vld [vmem:[%s3191_s16 + $0x40] sm:$0xff] }
 0x2b0   : > { %v2779_v27 = vpop.eup %2778  ;;  %v1222_v9 = vsub.f32 %v3482_v56, %v3881_v7  ;;  %v2088_v41 = vadd.f32 %v2087_v5, %v2086_v46  ;;  %v1634_v4 = vsel %vm1602_vm3, %v3418_v21, 0.0  ;;  %v2089_v0 = vsel %vm4617_vm8, %v2380_v1, 0.0 }
 0x2b1   : > { %1678 = vadd.xlane.f32.xlu0 %v1632_v52  ;;  %1360 = vadd.xlane.f32.xlu1 %v1313_v6  ;;  %v2881_v52 = vld [vmem:[%s3191_s16 + $0x38] sm:$0xff]  ;;  %v4718_v6 = vmov 0  ;;  %v1316_v3 = vsel %vm1105_vm1, %v2779_v27, 0.0  ;;  %v1790_v56 = vadd.s32 %v3745_v47, %v1757_v62  ;;  %vm1821_vm10 = vcmp.ge.s32.totalorder %v2882_v33, 0 }
 0x2b2   : > { %vm1820_vm14 = vcmp.ge.s32.totalorder %v2881_v52, 0  ;;  %vm1853_vm11 = vcmp.lt.s32.totalorder %v1789_v37, 1000  ;;  %v1758_v21 = vadd.s32 80, %v3731_v43  ;;  %vm1603_vm13 = vcmp.eq.s32.totalorder %v3266_v14, %v3646_v63  ;;  %v3939_v37 = vpop.xlane.xlu1 %1190 }
 0x2b3   : > { %vm3905_vm6 = vmand %vm1820_vm14, %vm1852_vm15  ;;  %v2781_v32 = vpop.eup %2780  ;;  %2786 = vpow2.f32 %v1278_v19  ;;  %v1274_v31 = vmul.f32 1.442695, %v1222_v9  ;;  %v1225_v36 = vsub.f32 %v3579_v25, %v3899_v60  ;;  %v2090_v46 = vadd.f32 %v2089_v0, %v2088_v41  ;;  %v2883_v25 = vld [vmem:[%s3191_s16 + $0x48] sm:$0xff]  ;;  %4722 = vst [vmem:[#allocation49_spill] sm:$0xff] %v3939_v37 }
 0x2b4   : > { %v4719_v6 = vsel %vm3905_vm6, 4294967295, %v4718_v6  ;;  %v2381_v12 = vsel %vm3905_vm6, 1.0, %v4709_v8  ;;  %v1314_v27 = vsel %vm1105_vm1, %v2781_v32, 0.0  ;;  %v1759_v62 = vadd.s32 88, %v3731_v43  ;;  %vm3930_vm14 = vmand %vm1821_vm10, %vm1853_vm11 }
 0x2b5   : > { %1680 = vadd.xlane.f32.xlu0 %v1633_v15  ;;  %1356 = vadd.xlane.f32.xlu1 %v1311_v53  ;;  %v3923_v15 = vpop.xlane.xlu0 %1180  ;;  %v1635_v53 = vsel %vm1603_vm13, %v3421_v22, 0.0  ;;  %v2783_v5 = vpop.eup %2782  ;;  %v2091_v52 = vsel %vm4617_vm8, %v2381_v12, 0.0  ;;  %v4720_v63 = vmov 0  ;;  %vm1822_vm15 = vcmp.ge.s32.totalorder %v2883_v25, 0 }
 0x2b6   : > { %v4721_v63 = vsel %vm3930_vm14, 4294967295, %v4720_v63  ;;  %vm1854_vm3 = vcmp.lt.s32.totalorder %v1790_v56, 1000  ;;  %v2382_v22 = vsel %vm3930_vm14, 1.0, %v4709_v8  ;;  %v1791_v1 = vadd.s32 %v3745_v47, %v1758_v21 }
 0x2b7   : > { %vm1604_vm10 = vcmp.eq.s32.totalorder %v3266_v14, %v3618_v58  ;;  %2788 = vpow2.f32 %v1274_v31  ;;  %v1280_v19 = vmul.f32 1.442695, %v1225_v36  ;;  %v1223_v9 = vsub.f32 %v3588_v38, %v3923_v15  ;;  %vm3948_vm11 = vmand %vm1822_vm15, %vm1854_vm3  ;;  %v3963_v36 = vpop.xlane.xlu1 %1186 }
 0x2b8   : > { %v2092_v41 = vadd.f32 %v2091_v52, %v2090_v46  ;;  %v4723_v12 = vmov 0  ;;  %v1792_v0 = vadd.s32 %v3745_v47, %v1759_v62  ;;  %v2093_v58 = vsel %vm4617_vm8, %v2382_v22, 0.0  ;;  %v2885_v52 = vld [vmem:[%s3191_s16 + $0x58] sm:$0xff] }
 0x2b9   : > { %1682 = vadd.xlane.f32.xlu0 %v1634_v4  ;;  %1366 = vadd.xlane.f32.xlu1 %v1316_v3  ;;  %v1636_v4 = vsel %vm1604_vm10, %v3411_v17, 0.0  ;;  %v1317_v3 = vsel %vm1105_vm1, %v2783_v5, 0.0  ;;  %v2785_v32 = vpop.eup %2784  ;;  %v4724_v12 = vsel %vm3948_vm11, 4294967295, %v4723_v12  ;;  %v2383_v38 = vsel %vm3948_vm11, 1.0, %v4709_v8  ;;  %v2884_v17 = vld [vmem:[%s3191_s16 + $0x50] sm:$0xff]  ;;  %v3981_v25 = vpop.xlane.xlu0 %1192 }
 0x2ba   : > { %vm1855_vm10 = vcmp.lt.s32.totalorder %v1791_v1, 1000  ;;  %v1760_v56 = vadd.s32 96, %v3731_v43  ;;  %vm1605_vm15 = vcmp.eq.s32.totalorder %v3266_v14, %v3623_v13  ;;  %v1228_v33 = vsub.f32 %v3503_v11, %v3939_v37  ;;  %4728 = vst [vmem:[#allocation50_spill] sm:$0xff] %v3981_v25 }
 0x2bb   : > { %2790 = vpow2.f32 %v1280_v19  ;;  %v1276_v21 = vmul.f32 1.442695, %v1223_v9  ;;  %v2094_v31 = vadd.f32 %v2093_v58, %v2092_v41  ;;  %v1637_v46 = vsel %vm1605_vm15, %v3414_v18, 0.0 }
 0x2bc   : > { %v2095_v5 = vsel %vm4617_vm8, %v2383_v38, 0.0  ;;  %vm1824_vm3 = vcmp.ge.s32.totalorder %v2885_v52, 0  ;;  %vm1856_vm13 = vcmp.lt.s32.totalorder %v1792_v0, 1000  ;;  %vm4725_vm11 = vcmp.ge.s32.totalorder %v2884_v17, 0  ;;  %v2886_v0 = vld [vmem:[%s3191_s16 + $0x60] sm:$0xff] }
 0x2bd   : > { %1684 = vadd.xlane.f32.xlu0 %v1635_v53  ;;  %1362 = vadd.xlane.f32.xlu1 %v1314_v27  ;;  %v1315_v53 = vsel %vm1105_vm1, %v2785_v32, 0.0  ;;  %v2787_v27 = vpop.eup %2786  ;;  %vm3972_vm14 = vmand %vm4725_vm11, %vm1855_vm10  ;;  %v4726_v11 = vmov 0  ;;  %v1761_v13 = vadd.s32 104, %v3731_v43  ;;  %v1793_v62 = vadd.s32 %v3745_v47, %v1760_v56  ;;  %v4005_v56 = vpop.xlane.xlu0 %1188 }
 0x2be   : > { %v4727_v11 = vsel %vm3972_vm14, 4294967295, %v4726_v11  ;;  %v2384_v18 = vsel %vm3972_vm14, 1.0, %v4709_v8  ;;  %vm1606_vm15 = vcmp.eq.s32.totalorder %v3266_v14, %v3629_v29  ;;  %v1286_v22 = vmul.f32 1.442695, %v1228_v33  ;;  %vm3987_vm11 = vmand %vm1824_vm3, %vm1856_vm13  ;;  %4731 = vst [vmem:[#allocation51_spill] sm:$0xff] %v4005_v56 }
 0x2bf   : > { %v1226_v1 = vsub.f32 %v3526_v23, %v3963_v36  ;;  %2792 = vpow2.f32 %v1276_v21  ;;  %v4729_v19 = vmov 0  ;;  %v2096_v9 = vadd.f32 %v2095_v5, %v2094_v31 }
 0x2c0   : > { %v4730_v19 = vsel %vm3987_vm11, 4294967295, %v4729_v19  ;;  %v1638_v41 = vsel %vm1606_vm15, %v3460_v44, 0.0  ;;  %v2385_v29 = vsel %vm3987_vm11, 1.0, %v4709_v8  ;;  %v2097_v32 = vsel %vm4617_vm8, %v2384_v18, 0.0 }
 0x2c1   : > { %1686 = vadd.xlane.f32.xlu0 %v1636_v4  ;;  %1368 = vadd.xlane.f32.xlu1 %v1317_v3  ;;  %v1320_v4 = vsel %vm1105_vm1, %v2787_v27, 0.0  ;;  %v2789_v3 = vpop.eup %2788  ;;  %v1794_v23 = vadd.s32 %v3745_v47, %v1761_v13  ;;  %vm1825_vm13 = vcmp.ge.s32.totalorder %v2886_v0, 0  ;;  %vm1857_vm10 = vcmp.lt.s32.totalorder %v1793_v62, 1000 }
 0x2c2   : > { %v1762_v44 = vadd.s32 112, %v3731_v43  ;;  %vm1607_vm3 = vcmp.eq.s32.totalorder %v3266_v14, %v3635_v26  ;;  %2794 = vpow2.f32 %v1286_v22  ;;  %v1282_v58 = vmul.f32 1.442695, %v1226_v1  ;;  %vm4013_vm11 = vmand %vm1825_vm13, %vm1857_vm10 }
 0x2c3   : > { %v1229_v38 = vsub.f32 %v3594_v48, %v3981_v25  ;;  %v2098_v17 = vadd.f32 %v2097_v32, %v2096_v9  ;;  %v1639_v33 = vsel %vm1607_vm3, %v3463_v45, 0.0  ;;  %v1318_v21 = vsel %vm1105_vm1, %v2789_v3, 0.0  ;;  %v4020_v48 = vpop.xlane.xlu1 %1198 }
 0x2c4   : > { %v4732_v26 = vmov 0  ;;  %vm1858_vm14 = vcmp.lt.s32.totalorder %v1794_v23, 1000  ;;  %v2386_v45 = vsel %vm4013_vm11, 1.0, %v4709_v8  ;;  %4734 = vst [vmem:[#allocation52_spill] sm:$0xff] %v4020_v48  ;;  %v1795_v27 = vadd.s32 %v3745_v47, %v1762_v44 }
 0x2c5   : > { %1688 = vadd.xlane.f32.xlu0 %v1637_v46  ;;  %1364 = vadd.xlane.f32.xlu1 %v1315_v53  ;;  %v2791_v31 = vpop.eup %2790  ;;  %v2099_v46 = vsel %vm4617_vm8, %v2385_v29, 0.0  ;;  %v2887_v53 = vld [vmem:[%s3191_s16 + $0x68] sm:$0xff]  ;;  %v4733_v26 = vsel %vm4013_vm11, 4294967295, %v4732_v26  ;;  %v1763_v5 = vadd.s32 120, %v3731_v43  ;;  %vm1608_vm13 = vcmp.eq.s32.totalorder %v3266_v14, %v3641_v54 }
 0x2c6   : > { %vm1826_vm15 = vcmp.ge.s32.totalorder %v2887_v53, 0  ;;  %2796 = vpow2.f32 %v1282_v58  ;;  %v1288_v52 = vmul.f32 1.442695, %v1229_v38  ;;  %v1227_v13 = vsub.f32 %v3602_v16, %v4005_v56 }
 0x2c7   : > { %v2100_v18 = vadd.f32 %v2099_v46, %v2098_v17  ;;  %v1640_v62 = vsel %vm1608_vm13, %v3443_v34, 0.0  ;;  %v1321_v22 = vsel %vm1105_vm1, %v2791_v31, 0.0  ;;  %vm4032_vm10 = vmand %vm1826_vm15, %vm1858_vm14  ;;  %v4735_v9 = vmov 0  ;;  %v2888_v34 = vld [vmem:[%s3191_s16 + $0x70] sm:$0xff]  ;;  %v4049_v0 = vpop.xlane.xlu1 %1194  ;;  %v4741_v46 = vld [vmem:[#allocation17_spill] sm:$0xff] }
 0x2c8   : > { %v4736_v9 = vsel %vm4032_vm10, 4294967295, %v4735_v9  ;;  %v2101_v54 = vsel %vm4617_vm8, %v2386_v45, 0.0  ;;  %v2387_v16 = vsel %vm4032_vm10, 1.0, %v4709_v8  ;;  %vm1827_vm3 = vcmp.ge.s32.totalorder %v2888_v34, 0  ;;  %4738 = vst [vmem:[#allocation54_spill] sm:$0xff] %v4049_v0 }
 0x2c9   : > { %1690 = vadd.xlane.f32.xlu0 %v1638_v41  ;;  %1374 = vadd.xlane.f32.xlu1 %v1320_v4  ;;  %v2793_v1 = vpop.eup %2792  ;;  %v1764_v41 = vadd.s32 128, %v3731_v43  ;;  %v4042_v4 = vpop.xlane.xlu0 %1200  ;;  %vm1859_vm13 = vcmp.lt.s32.totalorder %v1795_v27, 1000  ;;  %v1796_v3 = vadd.s32 %v3745_v47, %v1763_v5  ;;  %vm1609_vm14 = vcmp.eq.s32.totalorder %v3266_v14, %v3650_v50  ;;  %v2889_v50 = vld [vmem:[%s3191_s16 + $0x78] sm:$0xff]  ;;  %v4743_v27 = vld [vmem:[#allocation11_spill] sm:$0xff] }
 0x2ca   : > { %4737 = vst [vmem:[#allocation53_spill] sm:$0xff] %v4042_v4  ;;  %v1232_v29 = vsub.f32 %v3547_v49, %v4020_v48  ;;  %2798 = vpow2.f32 %v1288_v52  ;;  %v1284_v32 = vmul.f32 1.442695, %v1227_v13  ;;  %v2102_v23 = vadd.f32 %v2101_v54, %v2100_v18  ;;  %vm4058_vm15 = vmand %vm1827_vm3, %vm1859_vm13 }
 0x2cb   : > { %v1641_v44 = vsel %vm1609_vm14, %v3447_v39, 0.0  ;;  %v1319_v58 = vsel %vm1105_vm1, %v2793_v1, 0.0  ;;  %v2103_v17 = vsel %vm4617_vm8, %v2387_v16, 0.0  ;;  %v4739_v49 = vmov 0  ;;  %v4748_v16 = vld [vmem:[#allocation20_spill] sm:$0xff] }
 0x2cc   : > { %v2795_v38 = vpop.eup %2794  ;;  %v4740_v49 = vsel %vm4058_vm15, 4294967295, %v4739_v49  ;;  %v1765_v39 = vadd.s32 136, %v3731_v43  ;;  %vm1860_vm14 = vcmp.lt.s32.totalorder %v1796_v3, 1000  ;;  %vm1610_vm8 = vcmp.eq.s32.totalorder %v3266_v14, %v3648_v40  ;;  %v4749_v3 = vld [vmem:[#allocation19_spill] sm:$0xff] }
 0x2cd   : > { %1692 = vadd.xlane.f32.xlu0 %v1639_v33  ;;  %1370 = vadd.xlane.f32.xlu1 %v1318_v21  ;;  %v1797_v33 = vadd.s32 %v3745_v47, %v1764_v41  ;;  %v2388_v21 = vsel %vm4058_vm15, 1.0, %v4709_v8  ;;  %v1294_v31 = vmul.f32 1.442695, %v1232_v29  ;;  %v1230_v53 = vsub.f32 %v4741_v46, %v4049_v0  ;;  %v4071_v45 = vpop.xlane.xlu0 %1196  ;;  %v4754_v46 = vld [vmem:[#allocation22_spill] sm:$0xff] }
 0x2ce   : > { %2800 = vpow2.f32 %v1284_v32  ;;  %4742 = vst [vmem:[#allocation17_spill] sm:$0xff] %v4071_v45  ;;  %v1642_v5 = vsel %vm1610_vm8, %v4743_v27, 0.0  ;;  %v1324_v52 = vsel %vm1105_vm1, %v2795_v38, 0.0  ;;  %v2104_v13 = vadd.f32 %v2103_v17, %v2102_v23  ;;  %v4752_v23 = vld [vmem:[#allocation9_spill] sm:$0xff] }
 0x2cf   : > { %vm1861_vm13 = vcmp.lt.s32.totalorder %v1797_v33, 1000  ;;  %vm4744_vm10 = vcmask 7168   ;;  %vm4745_vm15 = vcmp.ge.s32.totalorder %v2889_v50, 0  ;;  %v1798_v1 = vadd.s32 %v3745_v47, %v1765_v39  ;;  %v2891_v39 = vld [vmem:[%s3191_s16 + $0x88] sm:$0xff] }
 0x2d0   : > { %v2797_v18 = vpop.eup %2796  ;;  %v2105_v40 = vsel %vm4744_vm10, %v2388_v21, 0.0  ;;  %vm4080_vm11 = vmand %vm4745_vm15, %vm1860_vm14  ;;  %v1766_v54 = vadd.s32 144, %v3731_v43  ;;  %vm1612_vm8 = vcmp.eq.s32.totalorder %v3266_v14, %v4748_v16  ;;  %2802 = vpow2.f32 %v1294_v31 }
 0x2d1   : > { %1694 = vadd.xlane.f32.xlu0 %v1640_v62  ;;  %1376 = vadd.xlane.f32.xlu1 %v1321_v22  ;;  %v2890_v62 = vld [vmem:[%s3191_s16 + $0x80] sm:$0xff]  ;;  %v4746_v22 = vmov 0  ;;  %v2389_v41 = vsel %vm4080_vm11, 1.0, %v4709_v8  ;;  %v1290_v34 = vmul.f32 1.442695, %v1230_v53  ;;  %v1231_v29 = vsub.f32 %v4749_v3, %v4071_v45  ;;  %v4755_v53 = vld [vmem:[#allocation18_spill] sm:$0xff] }
 0x2d2   : > { %vm1829_vm3 = vcmp.ge.s32.totalorder %v2890_v62, 0  ;;  %v4747_v22 = vsel %vm4080_vm11, 4294967295, %v4746_v22  ;;  %v4750_v32 = vmov 0  ;;  %v2106_v38 = vadd.f32 %v2105_v40, %v2104_v13  ;;  %v2903_v45 = vld [vmem:[%s3191_s16 + $0xf0] sm:$0xff] }
 0x2d3   : > { %vm4093_vm10 = vmand %vm1829_vm3, %vm1861_vm13  ;;  %vm4753_vm15 = vcmask 7168   ;;  %vm1830_vm14 = vcmp.ge.s32.totalorder %v2891_v39, 0  ;;  %vm1862_vm3 = vcmp.lt.s32.totalorder %v1798_v1, 1000  ;;  %v1799_v21 = vadd.s32 %v3745_v47, %v1766_v54 }
 0x2d4   : > { %v4751_v32 = vsel %vm4093_vm10, 4294967295, %v4750_v32  ;;  %v2799_v17 = vpop.eup %2798  ;;  %v2390_v33 = vsel %vm4093_vm10, 1.0, %v4709_v8  ;;  %v2107_v50 = vsel %vm4753_vm15, %v2389_v41, 0.0  ;;  %v1767_v31 = vadd.s32 152, %v3731_v43  ;;  %v2892_v41 = vld [vmem:[%s3191_s16 + $0x90] sm:$0xff]  ;;  %vm4117_vm10 = vmand %vm1830_vm14, %vm1862_vm3 }
 0x2d5   : > { %1696 = vadd.xlane.f32.xlu0 %v1641_v44  ;;  %1372 = vadd.xlane.f32.xlu1 %v1319_v58  ;;  %v1644_v44 = vsel %vm1612_vm8, %v4752_v23, 0.0  ;;  %v1322_v58 = vsel %vm1105_vm1, %v2797_v18, 0.0  ;;  %vm1614_vm13 = vcmp.eq.s32.totalorder %v3266_v14, %v4754_v46  ;;  %2804 = vpow2.f32 %v1290_v34  ;;  %vm4757_vm8 = vmmov %vm4753_vm15 }
 0x2d6   : > { %v1233_v27 = vsub.f32 %v4755_v53, %v4042_v4  ;;  %v1325_v18 = vsel %vm1105_vm1, %v2799_v17, 0.0  ;;  %v2108_v62 = vadd.f32 %v2107_v50, %v2106_v38  ;;  %v2109_v1 = vsel %vm4757_vm8, %v2390_v33, 0.0  ;;  %v2893_v50 = vld [vmem:[%s3191_s16 + $0x98] sm:$0xff] }
 0x2d7   : > { %vm1831_vm15 = vcmp.ge.s32.totalorder %v2892_v41, 0  ;;  %v4758_v54 = vmov 0  ;;  %v1768_v16 = vadd.s32 160, %v3731_v43  ;;  %v2391_v34 = vsel %vm4117_vm10, 1.0, %v4709_v8 }
 0x2d8   : > { %v2801_v40 = vpop.eup %2800  ;;  %v4759_v54 = vsel %vm4117_vm10, 4294967295, %v4758_v54  ;;  %v1800_v3 = vadd.s32 %v3745_v47, %v1767_v31  ;;  %v1296_v23 = vmul.f32 1.442695, %v1233_v27  ;;  %v2110_v17 = vadd.f32 %v2109_v1, %v2108_v62 }
 0x2d9   : > { %1698 = vadd.xlane.f32.xlu0 %v1642_v5  ;;  %1382 = vadd.xlane.f32.xlu1 %v1324_v52  ;;  %v1292_v5 = vmul.f32 1.442695, %v1231_v29  ;;  %v4756_v52 = vld [vmem:[#allocation15_spill] sm:$0xff]  ;;  %v4760_v29 = vld [vmem:[#allocation25_spill] sm:$0xff]  ;;  %v1323_v38 = vsel %vm1105_vm1, %v2801_v40, 0.0  ;;  %vm1832_vm14 = vcmp.ge.s32.totalorder %v2893_v50, 0  ;;  %v1801_v31 = vadd.s32 %v3745_v47, %v1768_v16 }
 0x2da   : > { %v1646_v13 = vsel %vm1614_vm13, %v4756_v52, 0.0  ;;  %vm1863_vm13 = vcmp.lt.s32.totalorder %v1799_v21, 1000  ;;  %vm1616_vm8 = vcmp.eq.s32.totalorder %v3266_v14, %v4760_v29  ;;  %v2803_v33 = vpop.eup %2802  ;;  %vm4762_vm3 = vcmask 7168  }
 0x2db   : > { %2806 = vpow2.f32 %v1292_v5  ;;  %v2111_v39 = vsel %vm4762_vm3, %v2391_v34, 0.0  ;;  %vm4134_vm10 = vmand %vm1831_vm15, %vm1863_vm13  ;;  %v4763_v21 = vmov 0  ;;  %v1769_v46 = vadd.s32 168, %v3731_v43 }
 0x2dc   : > { %v4764_v21 = vsel %vm4134_vm10, 4294967295, %v4763_v21  ;;  %v2392_v53 = vsel %vm4134_vm10, 1.0, %v4709_v8  ;;  %2808 = vpow2.f32 %v1296_v23  ;;  %v1328_v27 = vsel %vm1105_vm1, %v2803_v33, 0.0  ;;  %vm4765_vm13 = vmmov %vm4762_vm3  ;;  %v2895_v23 = vld [vmem:[%s3191_s16 + $0xa8] sm:$0xff] }
 0x2dd   : > { %1702 = vadd.xlane.f32.xlu0 %v1644_v44  ;;  %1378 = vadd.xlane.f32.xlu1 %v1322_v58  ;;  %v4761_v44 = vld [vmem:[#allocation13_spill] sm:$0xff]  ;;  %v2112_v5 = vadd.f32 %v2111_v39, %v2110_v17  ;;  %v4766_v62 = vmov 0  ;;  %vm1865_vm11 = vcmp.lt.s32.totalorder %v1801_v31, 1000  ;;  %v1802_v40 = vadd.s32 %v3745_v47, %v1769_v46 }
 0x2de   : > { %v1648_v58 = vsel %vm1616_vm8, %v4761_v44, 0.0  ;;  %vm1864_vm8 = vcmp.lt.s32.totalorder %v1800_v3, 1000  ;;  %v1770_v41 = vadd.s32 176, %v3731_v43  ;;  %v4768_v29 = vmov 0 }
 0x2df   : > { %v2805_v52 = vpop.eup %2804  ;;  %vm4148_vm3 = vmand %vm1832_vm14, %vm1864_vm8  ;;  %vm1834_vm14 = vcmp.ge.s32.totalorder %v2895_v23, 0  ;;  %vm4770_vm8 = vcmask 7168   ;;  %v1771_v17 = vadd.s32 184, %v3731_v43  ;;  %v4772_v46 = vmov 0 }
 0x2e0   : > { %v4767_v62 = vsel %vm4148_vm3, 4294967295, %v4766_v62  ;;  %v2393_v1 = vsel %vm4148_vm3, 1.0, %v4709_v8  ;;  %v1326_v16 = vsel %vm1105_vm1, %v2805_v52, 0.0  ;;  %vm1866_vm3 = vcmp.lt.s32.totalorder %v1802_v40, 1000 }
 0x2e1   : > { %1706 = vadd.xlane.f32.xlu0 %v1646_v13  ;;  %1384 = vadd.xlane.f32.xlu1 %v1325_v18  ;;  %v2894_v13 = vld [vmem:[%s3191_s16 + $0xa0] sm:$0xff]  ;;  %v2113_v18 = vsel %vm4765_vm13, %v2392_v53, 0.0  ;;  %v2115_v44 = vsel %vm4770_vm8, %v2393_v1, 0.0  ;;  %v2896_v53 = vld [vmem:[%s3191_s16 + $0xb0] sm:$0xff]  ;;  %v1804_v52 = vadd.s32 %v3745_v47, %v1771_v17  ;;  %v2897_v1 = vld [vmem:[%s3191_s16 + $0xb8] sm:$0xff]  ;;  %v1776_v23 = vadd.s32 224, %v3731_v43 }
 0x2e2   : > { %vm1833_vm15 = vcmp.ge.s32.totalorder %v2894_v13, 0  ;;  %v2114_v34 = vadd.f32 %v2113_v18, %v2112_v5  ;;  %v1772_v5 = vadd.s32 192, %v3731_v43  ;;  %v1777_v25 = vadd.s32 232, %v3731_v43 }
 0x2e3   : > { %vm4159_vm13 = vmand %vm1833_vm15, %vm1865_vm11 }
 0x2e4   : > { %v4769_v29 = vsel %vm4159_vm13, 4294967295, %v4768_v29  ;;  %v2116_v50 = vadd.f32 %v2115_v44, %v2114_v34  ;;  %vm4771_vm11 = vmmov %vm4770_vm8  ;;  %vm1835_vm8 = vcmp.ge.s32.totalorder %v2896_v53, 0  ;;  %v4778_v44 = vld [vmem:[#allocation21_spill] sm:$0xff] }
 0x2e5   : > { %1710 = vadd.xlane.f32.xlu0 %v1648_v58  ;;  %1380 = vadd.xlane.f32.xlu1 %v1323_v38  ;;  %v2807_v3 = vpop.eup %2806  ;;  %v2394_v58 = vsel %vm4159_vm13, 1.0, %v4709_v8  ;;  %v1803_v38 = vadd.s32 %v3745_v47, %v1770_v41  ;;  %vm4173_vm15 = vmand %vm1834_vm14, %vm1866_vm3  ;;  %vm1836_vm14 = vcmp.ge.s32.totalorder %v2897_v1, 0  ;;  %v4775_v41 = vmov 0 }
 0x2e6   : > { %v1327_v33 = vsel %vm1105_vm1, %v2807_v3, 0.0  ;;  %v2809_v39 = vpop.eup %2808  ;;  %v2117_v31 = vsel %vm4771_vm11, %v2394_v58, 0.0  ;;  %v4773_v46 = vsel %vm4173_vm15, 4294967295, %v4772_v46  ;;  %vm4774_vm3 = vmmov %vm4771_vm11  ;;  %v1774_v3 = vadd.s32 208, %v3731_v43  ;;  %v4199_v58 = vpop.xlane.xlu0 %1662 }
 0x2e7   : > { %vm1867_vm13 = vcmp.lt.s32.totalorder %v1803_v38, 1000  ;;  %v1329_v13 = vsel %vm1105_vm1, %v2809_v39, 0.0  ;;  %v2118_v18 = vadd.f32 %v2117_v31, %v2116_v50  ;;  %vm1611_vm1 = vcmp.eq.s32.totalorder %v3266_v14, %v4778_v44  ;;  %v4779_v38 = vld [vmem:[#allocation12_spill] sm:$0xff]  ;;  %v2898_v31 = vld [vmem:[%s3191_s16 + $0xc0] sm:$0xff] }
 0x2e8   : > { %vm4187_vm11 = vmand %vm1835_vm8, %vm1867_vm13  ;;  %v1643_v17 = vsel %vm1611_vm1, %v4779_v38, 0.0  ;;  %v4781_v39 = vmov 0  ;;  %v4786_v1 = vmov 0  ;;  %v1773_v38 = vadd.s32 200, %v3731_v43 }
 0x2e9   : > { %1390 = vadd.xlane.f32.xlu1 %v1328_v27  ;;  %v2395_v27 = vsel %vm4173_vm15, 1.0, %v4709_v8  ;;  %v4776_v41 = vsel %vm4187_vm11, 4294967295, %v4775_v41  ;;  %v2396_v34 = vsel %vm4187_vm11, 1.0, %v4709_v8  ;;  %vm1868_vm15 = vcmp.lt.s32.totalorder %v1804_v52, 1000  ;;  %vm4780_vm13 = vmmov %vm4774_vm3  ;;  %v4784_v52 = vld [vmem:[#allocation23_spill] sm:$0xff] }
 0x2ea   : > { %v2119_v40 = vsel %vm4774_vm3, %v2395_v27, 0.0  ;;  %4777 = vst [vmem:[#allocation11_spill] sm:$0xff] %v4776_v41  ;;  %v2121_v50 = vsel %vm4780_vm13, %v2396_v34, 0.0  ;;  %vm4203_vm8 = vmand %vm1836_vm14, %vm1868_vm15  ;;  %vm1837_vm3 = vcmp.ge.s32.totalorder %v2898_v31, 0  ;;  %v1807_v27 = vadd.s32 %v3745_v47, %v1774_v3  ;;  %v4226_v44 = vpop.xlane.xlu0 %1664  ;;  %v4791_v31 = vld [vmem:[#allocation16_spill] sm:$0xff]  ;;  %v4837_v41 = vld [vmem:[#allocation33_spill] sm:$0xff] }
 0x2eb   : > { %v4782_v39 = vsel %vm4203_vm8, 4294967295, %v4781_v39  ;;  %v2397_v53 = vsel %vm4203_vm8, 1.0, %v4709_v8  ;;  %vm1613_vm1 = vcmp.eq.s32.totalorder %v3266_v14, %v4784_v52  ;;  %vm4789_vm14 = vmmov %vm4780_vm13 }
 0x2ec   : > { %4783 = vst [vmem:[#allocation20_spill] sm:$0xff] %v4782_v39  ;;  %v2123_v34 = vsel %vm4789_vm14, %v2397_v53, 0.0 }
 0x2ed   : > { %1386 = vadd.xlane.f32.xlu1 %v1326_v16  ;;  %v1805_v16 = vadd.s32 %v3745_v47, %v1772_v5  ;;  %v1809_v5 = vadd.s32 %v3745_v47, %v1776_v23  ;;  %v2899_v23 = vld [vmem:[%s3191_s16 + $0xd0] sm:$0xff] }
 0x2ef   : > { %vm1869_vm11 = vcmp.lt.s32.totalorder %v1805_v16, 1000  ;;  %v1778_v16 = vadd.s32 240, %v3731_v43 }
 0x2f0   : > { %vm4216_vm15 = vmand %vm1837_vm3, %vm1869_vm11  ;;  %vm1873_vm3 = vcmp.lt.s32.totalorder %v1809_v5, 1000  ;;  %v4796_v5 = vmov 0 }
 0x2f1   : > { %1388 = vadd.xlane.f32.xlu1 %v1327_v33  ;;  %v2120_v33 = vadd.f32 %v2119_v40, %v2118_v18  ;;  %v4787_v1 = vsel %vm4216_vm15, 4294967295, %v4786_v1  ;;  %v2398_v3 = vsel %vm4216_vm15, 1.0, %v4709_v8  ;;  %vm4792_vm15 = vcmp.ge.s32.totalorder %v2899_v23, 0 }
 0x2f2   : > { %4788 = vst [vmem:[#allocation19_spill] sm:$0xff] %v4787_v1  ;;  %v4801_v23 = vmov 0 }
 0x2f3   : > { %v2122_v40 = vadd.f32 %v2121_v50, %v2120_v33  ;;  %v4790_v33 = vld [vmem:[#allocation24_spill] sm:$0xff]  ;;  %v2901_v50 = vld [vmem:[%s3191_s16 + $0xc8] sm:$0xff] }
 0x2f4   : > { %vm1615_vm8 = vcmp.eq.s32.totalorder %v3266_v14, %v4790_v33  ;;  %v4804_v33 = vld [vmem:[#allocation14_spill] sm:$0xff] }
 0x2f5   : > { %1392 = vadd.xlane.f32.xlu1 %v1329_v13  ;;  %v4785_v13 = vld [vmem:[#allocation10_spill] sm:$0xff]  ;;  %v1647_v53 = vsel %vm1615_vm8, %v4791_v31, 0.0  ;;  %v2124_v52 = vadd.f32 %v2123_v34, %v2122_v40  ;;  %v1775_v34 = vadd.s32 216, %v3731_v43 }
 0x2f6   : > { %v1645_v18 = vsel %vm1613_vm1, %v4785_v13, 0.0  ;;  %vm1871_vm1 = vcmp.lt.s32.totalorder %v1807_v27, 1000  ;;  %v1806_v13 = vadd.s32 %v3745_v47, %v1773_v38  ;;  %v1811_v27 = vadd.s32 %v3745_v47, %v1778_v16  ;;  %v4799_v16 = vld [vmem:[#allocation26_spill] sm:$0xff]  ;;  %v4258_v38 = vpop.xlane.xlu0 %1666 }
 0x2f7   : > { %vm4238_vm10 = vmand %vm4792_vm15, %vm1871_vm1  ;;  %vm1617_vm14 = vcmp.eq.s32.totalorder %v3266_v14, %v4799_v16  ;;  %vm4800_vm15 = vcmp.ge.s32.totalorder %v2901_v50, 0  ;;  %v1808_v4 = vadd.s32 %v3745_v47, %v1775_v34  ;;  %v1810_v34 = vadd.s32 %v3745_v47, %v1777_v25 }
 0x2f8   : > { %v2400_v40 = vsel %vm4238_vm10, 1.0, %v4709_v8  ;;  %vm1870_vm8 = vcmp.lt.s32.totalorder %v1806_v13, 1000  ;;  %v1649_v31 = vsel %vm1617_vm14, %v4804_v33, 0.0  ;;  %v4816_v25 = vmov 0 }
 0x2f9   : > { %1700 = vadd.xlane.f32.xlu1 %v1643_v17  ;;  %v2900_v17 = vld [vmem:[%s3191_s16 + $0xe0] sm:$0xff]  ;;  %vm4254_vm1 = vmand %vm4800_vm15, %vm1870_vm8  ;;  %vm4805_vm8 = vcmask 7168   ;;  %vm1872_vm14 = vcmp.lt.s32.totalorder %v1808_v4, 1000  ;;  %v4811_v4 = vmov 0 }
 0x2fa   : > { %vm1841_vm11 = vcmp.ge.s32.totalorder %v2900_v17, 0  ;;  %v4793_v17 = vmov 0  ;;  %v4802_v23 = vsel %vm4254_vm1, 4294967295, %v4801_v23  ;;  %v2129_v50 = vsel %vm4805_vm8, %v2400_v40, 0.0  ;;  %vm4806_vm15 = vmmov %vm4805_vm8 }
 0x2fb   : > { %v4794_v17 = vsel %vm4238_vm10, 4294967295, %v4793_v17  ;;  %vm4242_vm6 = vmand %vm1841_vm11, %vm1873_vm3  ;;  %4803 = vst [vmem:[#allocation18_spill] sm:$0xff] %v4802_v23  ;;  %vm1875_vm3 = vcmp.lt.s32.totalorder %v1811_v27, 1000  ;;  %vm4810_vm8 = vcmp.ge.s32.totalorder %v2903_v45, 0  ;;  %v2905_v45 = vld [vmem:[%s3191_s16 + $0xf8] sm:$0xff] }
 0x2fc   : > { %4795 = vst [vmem:[#allocation9_spill] sm:$0xff] %v4794_v17  ;;  %v4797_v5 = vsel %vm4242_vm6, 4294967295, %v4796_v5  ;;  %v2402_v14 = vsel %vm4242_vm6, 1.0, %v4709_v8  ;;  %vm4814_vm6 = vcmask 7168  }
 0x2fd   : > { %1704 = vadd.xlane.f32.xlu1 %v1645_v18  ;;  %v2125_v18 = vsel %vm4780_vm13, %v2398_v3, 0.0  ;;  %4798 = vst [vmem:[#allocation22_spill] sm:$0xff] %v4797_v5  ;;  %v2902_v3 = vld [vmem:[%s3191_s16 + $0xd8] sm:$0xff] }
 0x2fe   : > { %vm1840_vm13 = vcmp.ge.s32.totalorder %v2902_v3, 0  ;;  %v2126_v13 = vadd.f32 %v2125_v18, %v2124_v52  ;;  %v4807_v52 = vmov 0  ;;  %v2904_v18 = vld [vmem:[%s3191_s16 + $0xe8] sm:$0xff]  ;;  %v2133_v3 = vsel %vm4814_vm6, %v2402_v14, 0.0  ;;  %s2161_s16 = scalar_lea.sflag [#allocation3], %s3263_s29 }
 0x2ff   : > { %vm1842_vm11 = vcmp.ge.s32.totalorder %v2904_v18, 0 }
 0x301   : > { %1708 = vadd.xlane.f32.xlu1 %v1647_v53  ;;  %v2399_v53 = vsel %vm4254_vm1, 1.0, %v4709_v8  ;;  %vm4273_vm1 = vmand %vm1840_vm13, %vm1872_vm14  ;;  %vm1874_vm14 = vcmp.lt.s32.totalorder %v1810_v34, 1000 }
 0x302   : > { %v2127_v16 = vsel %vm4806_vm15, %v2399_v53, 0.0  ;;  %v4808_v52 = vsel %vm4273_vm1, 4294967295, %v4807_v52  ;;  %v2401_v27 = vsel %vm4273_vm1, 1.0, %v4709_v8  ;;  %vm4283_vm15 = vmand %vm4810_vm8, %vm1875_vm3  ;;  %vm1844_vm3 = vcmp.ge.s32.totalorder %v2905_v45, 0 }
 0x303   : > { %v2128_v33 = vadd.f32 %v2127_v16, %v2126_v13  ;;  %4809 = vst [vmem:[#allocation15_spill] sm:$0xff] %v4808_v52  ;;  %v4812_v4 = vsel %vm4283_vm15, 4294967295, %v4811_v4  ;;  %vm4815_vm13 = vmmov %vm4814_vm6  ;;  %v2404_v53 = vsel %vm4283_vm15, 1.0, %v4709_v8  ;;  %v4292_v13 = vpop.xlane.xlu0 %1668 }
 0x304   : > { %4813 = vst [vmem:[#allocation25_spill] sm:$0xff] %v4812_v4  ;;  %vm4295_vm1 = vmand %vm1842_vm11, %vm1874_vm14 }
 0x305   : > { %1712 = vadd.xlane.f32.xlu1 %v1649_v31  ;;  %v2130_v40 = vadd.f32 %v2129_v50, %v2128_v33  ;;  %v2131_v31 = vsel %vm4815_vm13, %v2401_v27, 0.0  ;;  %v1779_v50 = vadd.s32 248, %v3731_v43  ;;  %v4817_v25 = vsel %vm4295_vm1, 4294967295, %v4816_v25  ;;  %vm4819_vm8 = vmmov %vm4814_vm6 }
 0x306   : > { %4818 = vst [vmem:[#allocation13_spill] sm:$0xff] %v4817_v25  ;;  %v2403_v14 = vsel %vm4295_vm1, 1.0, %v4709_v8  ;;  %v2137_v27 = vsel %vm4814_vm6, %v2404_v53, 0.0  ;;  %vm4823_vm11 = vmmov %vm4814_vm6 }
 0x307   : > { %v2132_v16 = vadd.f32 %v2131_v31, %v2130_v40  ;;  %v1812_v18 = vadd.s32 %v3745_v47, %v1779_v50  ;;  %v2135_v40 = vsel %vm4819_vm8, %v2403_v14, 0.0  ;;  %v4820_v31 = vmov 0  ;;  %v4310_v43 = vpop.xlane.xlu0 %1670  ;;  %vm4830_vm14 = vmmov %vm4814_vm6 }
 0x308   : > { %vm4849_vm8 = vnez %v4724_v12 }
 0x309   : > { %v2134_v33 = vadd.f32 %v2133_v3, %v2132_v16  ;;  %vm1876_vm13 = vcmp.lt.s32.totalorder %v1812_v18, 1000  ;;  %v1335_v16 = vpop.xlane.xlu1 %1334 }
 0x30a   : > { %vm4306_vm15 = vmand %vm1844_vm3, %vm1876_vm13 }
 0x30b   : > { %v2136_v34 = vadd.f32 %v2135_v40, %v2134_v33  ;;  %v4821_v31 = vsel %vm4306_vm15, 4294967295, %v4820_v31  ;;  %v2405_v45 = vsel %vm4306_vm15, 1.0, %v4709_v8  ;;  %v4316_v53 = vpop.xlane.xlu0 %1672 }
 0x30c   : > { %4822 = vst [vmem:[#allocation21_spill] sm:$0xff] %v4821_v31  ;;  %v2139_v3 = vsel %vm4823_vm11, %v2405_v45, 0.0 }
 0x30d   : > { %v2138_v4 = vadd.f32 %v2137_v27, %v2136_v34 }
 0x30f   : > { %v2140_v47 = vadd.f32 %v2139_v3, %v2138_v4  ;;  %v4318_v50 = vpop.xlane.xlu0 %1674 }
 0x311   : > { %2141 = vadd.xlane.f32.xlu1 %v2140_v47 }
 0x313   : > { %v1331_v33 = vpop.xlane.xlu0 %1330 }
 0x316   : > { %v1333_v14 = vpop.xlane.xlu1 %1332 }
 0x317   : > { %2810 = vlog2.f32 %v1333_v14  ;;  %v1337_v25 = vpop.xlane.xlu0 %1336 }
 0x318   : > { %2812 = vlog2.f32 %v1331_v33 }
 0x319   : > { %2814 = vlog2.f32 %v1335_v16 }
 0x31a   : > { %2816 = vlog2.f32 %v1337_v25 }
 0x31e   : > { %v1343_v45 = vpop.xlane.xlu0 %1342 }
 0x321   : > { %v2811_v27 = vpop.eup %2810 }
 0x322   : > { %v1339_v18 = vpop.xlane.xlu1 %1338  ;;  %v2813_v34 = vpop.eup %2812  ;;  %v1397_v4 = vmul.f32 0.6931472, %v2811_v27 }
 0x323   : > { %2818 = vlog2.f32 %v1339_v18  ;;  %v1395_v47 = vmul.f32 0.6931472, %v2813_v34  ;;  %v2815_v31 = vpop.eup %2814  ;;  %v4824_v34 = vld [vmem:[#allocation28_spill] sm:$0xff] }
 0x324   : > { %v1459_v5 = vadd.f32 %v1397_v4, %v3684_v55  ;;  %v2817_v33 = vpop.eup %2816  ;;  %v1399_v23 = vmul.f32 0.6931472, %v2815_v31  ;;  %v4825_v55 = vld [vmem:[#allocation30_spill] sm:$0xff] }
 0x325   : > { %v1458_v16 = vadd.f32 %v1395_v47, %v3674_v28  ;;  %v1401_v0 = vmul.f32 0.6931472, %v2817_v33  ;;  %v4829_v33 = vld [vmem:[#allocation35_spill] sm:$0xff] }
 0x326   : > { %v1345_v40 = vpop.xlane.xlu1 %1344  ;;  %v1715_v48 = vsub.f32 %v1459_v5, %v3690_v59  ;;  %v1460_v17 = vadd.f32 %v1399_v23, %v4824_v34  ;;  %v4826_v59 = vld [vmem:[#allocation29_spill] sm:$0xff] }
 0x327   : > { %v1714_v4 = vsub.f32 %v1458_v16, %v4825_v55  ;;  %v1461_v5 = vadd.f32 %v1401_v0, %v4826_v59  ;;  %v4833_v55 = vld [vmem:[#allocation31_spill] sm:$0xff] }
 0x328   : > { %v1910_v31 = vsel %vm3774_vm4, %v1715_v48, 0.0  ;;  %vm4832_vm4 = vmmov %vm4814_vm6 }
 0x329   : > { %v1943_v16 = vsel %vm4830_vm14, %v1910_v31, 0.0  ;;  %v1717_v0 = vsub.f32 %v1461_v5, %v4833_v55  ;;  %v4835_v31 = vld [vmem:[#allocation38_spill] sm:$0xff]  ;;  %vm4839_vm3 = vmmov %vm4832_vm4  ;;  %vm4853_vm14 = vnez %v4727_v11 }
 0x32a   : > { %v1341_v8 = vpop.xlane.xlu1 %1340 }
 0x32b   : > { %2820 = vlog2.f32 %v1341_v8 }
 0x32c   : > { %2822 = vlog2.f32 %v1343_v45 }
 0x32d   : > { %v2819_v25 = vpop.eup %2818  ;;  %2824 = vlog2.f32 %v1345_v40  ;;  %v4827_v40 = vld [vmem:[#allocation27_spill] sm:$0xff] }
 0x32e   : > { %v1351_v3 = vpop.xlane.xlu1 %1350  ;;  %v1403_v56 = vmul.f32 0.6931472, %v2819_v25  ;;  %v1716_v1 = vsub.f32 %v1460_v17, %v4827_v40  ;;  %v4831_v25 = vld [vmem:[#allocation34_spill] sm:$0xff] }
 0x330   : > { %v1462_v23 = vadd.f32 %v1403_v56, %v4829_v33  ;;  %v1911_v39 = vsel %vm3811_vm9, %v1716_v1, 0.0  ;;  %v4834_v56 = vld [vmem:[#allocation36_spill] sm:$0xff]  ;;  %vm4838_vm9 = vmmov %vm4832_vm4 }
 0x332   : > { %v1353_v52 = vpop.xlane.xlu1 %1352  ;;  %v1347_v14 = vpop.xlane.xlu0 %1346  ;;  %v1718_v40 = vsub.f32 %v1462_v23, %v4834_v56 }
 0x333   : > { %2826 = vlog2.f32 %v1347_v14  ;;  %v1909_v14 = vsel %vm3787_vm5, %v1714_v4, 0.0  ;;  %vm4836_vm5 = vmmov %vm4832_vm4 }
 0x334   : > { %v1913_v1 = vsel %vm3848_vm0, %v1718_v40, 0.0  ;;  %vm4844_vm0 = vmmov %vm4839_vm3 }
 0x335   : > { %v2821_v27 = vpop.eup %2820  ;;  %v1949_v20 = vsel %vm4839_vm3, %v1913_v1, 0.0  ;;  %vm4848_vm6 = vmmov %vm4844_vm0 }
 0x336   : > { %v4323_v18 = vpop.xlane.xlu1 %1358  ;;  %v1349_v8 = vpop.xlane.xlu0 %1348  ;;  %v1405_v28 = vmul.f32 0.6931472, %v2821_v27  ;;  %v1942_v27 = vsel %vm4832_vm4, %v1909_v14, 0.0  ;;  %v1912_v14 = vsel %vm3828_vm12, %v1717_v0, 0.0  ;;  %v4840_v0 = vld [vmem:[#allocation32_spill] sm:$0xff]  ;;  %vm4842_vm12 = vmmov %vm4839_vm3  ;;  %vm4860_vm3 = vnez %v4733_v26 }
 0x337   : > { %2828 = vlog2.f32 %v1349_v8  ;;  %v2823_v34 = vpop.eup %2822  ;;  %v1944_v17 = vadd.f32 %v1943_v16, %v1942_v27  ;;  %v1947_v27 = vsel %vm4838_vm9, %v1912_v14, 0.0  ;;  %vm4851_vm13 = vmmov %vm4844_vm0 }
 0x338   : > { %v1463_v8 = vadd.f32 %v1405_v28, %v4831_v25  ;;  %2830 = vlog2.f32 %v1351_v3  ;;  %v2825_v59 = vpop.eup %2824  ;;  %v1407_v4 = vmul.f32 0.6931472, %v2823_v34  ;;  %v1945_v25 = vsel %vm4836_vm5, %v1911_v39, 0.0  ;;  %vm4852_vm11 = vmmov %vm4844_vm0 }
 0x339   : > { %2832 = vlog2.f32 %v1353_v52  ;;  %v1409_v5 = vmul.f32 0.6931472, %v2825_v59  ;;  %v1946_v55 = vadd.f32 %v1945_v25, %v1944_v17  ;;  %v4841_v17 = vld [vmem:[#allocation42_spill] sm:$0xff]  ;;  %vm4856_vm4 = vmmov %vm4844_vm0  ;;  %vm4857_vm5 = vnez %v4730_v19 }
 0x33a   : > { %v1355_v45 = vpop.xlane.xlu1 %1354  ;;  %v4329_v47 = vpop.xlane.xlu0 %1676  ;;  %v1719_v37 = vsub.f32 %v1463_v8, %v4835_v31  ;;  %v1464_v35 = vadd.f32 %v1407_v4, %v4837_v41  ;;  %vm4859_vm9 = vmmov %vm4844_vm0 }
 0x33b   : > { %2834 = vlog2.f32 %v1355_v45  ;;  %v1465_v59 = vadd.f32 %v1409_v5, %v4840_v0  ;;  %v1948_v39 = vadd.f32 %v1947_v27, %v1946_v55 }
 0x33c   : > { %v1914_v52 = vsel %vm3866_vm7, %v1719_v37, 0.0  ;;  %v1720_v30 = vsub.f32 %v1464_v35, %v4199_v58  ;;  %v4843_v37 = vld [vmem:[#allocation39_spill] sm:$0xff]  ;;  %vm4845_vm7 = vnez %v4719_v6 }
 0x33d   : > { %v2827_v33 = vpop.eup %2826  ;;  %v1951_v56 = vsel %vm4842_vm12, %v1914_v52, 0.0  ;;  %v1950_v24 = vadd.f32 %v1949_v20, %v1948_v39  ;;  %v1721_v31 = vsub.f32 %v1465_v59, %v4226_v44  ;;  %v4850_v59 = vld [vmem:[#allocation37_spill] sm:$0xff]  ;;  %vm4861_vm12 = vnez %v4736_v9 }
 0x33e   : > { %v1361_v57 = vpop.xlane.xlu1 %1360  ;;  %v4338_v48 = vpop.xlane.xlu0 %1678  ;;  %v1411_v34 = vmul.f32 0.6931472, %v2827_v33 }
 0x33f   : > { %v1952_v14 = vadd.f32 %v1951_v56, %v1950_v24  ;;  %v1916_v1 = vsel %vm4845_vm7, %v1721_v31, 0.0  ;;  %vm4863_vm7 = vmmov %vm4844_vm0 }
 0x340   : > { %v1466_v4 = vadd.f32 %v1411_v34, %v4841_v17  ;;  %v4846_v34 = vld [vmem:[#allocation40_spill] sm:$0xff] }
 0x341   : > { %v2829_v28 = vpop.eup %2828 }
 0x342   : > { %v1357_v3 = vpop.xlane.xlu1 %1356  ;;  %v4352_v23 = vpop.xlane.xlu0 %1680  ;;  %v1413_v16 = vmul.f32 0.6931472, %v2829_v28  ;;  %v1722_v58 = vsub.f32 %v1466_v4, %v4258_v38 }
 0x343   : > { %2836 = vlog2.f32 %v1357_v3  ;;  %v2831_v41 = vpop.eup %2830  ;;  %v1915_v3 = vsel %vm3890_vm2, %v1720_v30, 0.0  ;;  %vm4847_vm2 = vnez %v4721_v63 }
 0x344   : > { %v1467_v40 = vadd.f32 %v1413_v16, %v4843_v37  ;;  %v1415_v28 = vmul.f32 0.6931472, %v2831_v41  ;;  %v2833_v25 = vpop.eup %2832  ;;  %2838 = vlog2.f32 %v4323_v18  ;;  %v1953_v35 = vsel %vm4844_vm0, %v1915_v3, 0.0 }
 0x345   : > { %v1417_v52 = vmul.f32 0.6931472, %v2833_v25  ;;  %v2835_v16 = vpop.eup %2834  ;;  %v1954_v27 = vadd.f32 %v1953_v35, %v1952_v14  ;;  %v1917_v42 = vsel %vm4847_vm2, %v1722_v58, 0.0  ;;  %2840 = vlog2.f32 %v1361_v57 }
 0x346   : > { %v1367_v8 = vpop.xlane.xlu1 %1366  ;;  %v4363_v45 = vpop.xlane.xlu0 %1682  ;;  %v1723_v5 = vsub.f32 %v1467_v40, %v4292_v13  ;;  %v1468_v44 = vadd.f32 %v1415_v28, %v4846_v34  ;;  %v1955_v13 = vsel %vm4848_vm6, %v1916_v1, 0.0  ;;  %v1957_v30 = vsel %vm4851_vm13, %v1917_v42, 0.0  ;;  %v4855_v28 = vld [vmem:[#allocation45_spill] sm:$0xff]  ;;  %vm4865_vm6 = vmmov %vm4844_vm0 }
 0x347   : > { %v1469_v41 = vadd.f32 %v1417_v52, %v4850_v59  ;;  %v1956_v63 = vadd.f32 %v1955_v13, %v1954_v27  ;;  %v1419_v39 = vmul.f32 0.6931472, %v2835_v16  ;;  %vm4864_vm2 = vnez %v4740_v49 }
 0x348   : > { %v1918_v20 = vsel %vm4849_vm8, %v1723_v5, 0.0  ;;  %v1724_v0 = vsub.f32 %v1468_v44, %v4310_v43  ;;  %vm4866_vm8 = vnez %v4747_v22  ;;  %vm4868_vm13 = vnez %v4751_v32 }
 0x349   : > { %v1959_v17 = vsel %vm4852_vm11, %v1918_v20, 0.0  ;;  %v1958_v4 = vadd.f32 %v1957_v30, %v1956_v63  ;;  %v1725_v43 = vsub.f32 %v1469_v41, %v4316_v53  ;;  %vm4869_vm11 = vnez %v4759_v54 }
 0x34a   : > { %v1363_v33 = vpop.xlane.xlu1 %1362  ;;  %v4377_v38 = vpop.xlane.xlu0 %1684  ;;  %v1919_v12 = vsel %vm4853_vm14, %v1724_v0, 0.0  ;;  %vm4870_vm14 = vmmov %vm4844_vm0 }
 0x34b   : > { %2842 = vlog2.f32 %v1363_v33  ;;  %v1960_v40 = vadd.f32 %v1959_v17, %v1958_v4  ;;  %v4854_v33 = vld [vmem:[#allocation46_spill] sm:$0xff]  ;;  %v1961_v35 = vsel %vm4856_vm4, %v1919_v12, 0.0  ;;  %v1920_v1 = vsel %vm4857_vm5, %v1725_v43, 0.0  ;;  %vm4871_vm4 = vmmov %vm4844_vm0 }
 0x34c   : > { %v1470_v31 = vadd.f32 %v1419_v39, %v4854_v33  ;;  %v1963_v13 = vsel %vm4859_vm9, %v1920_v1, 0.0  ;;  %vm4872_vm5 = vmmov %vm4844_vm0  ;;  %vm4873_vm9 = vnez %v4764_v21 }
 0x34d   : > { %v2837_v18 = vpop.eup %2836  ;;  %v1962_v34 = vadd.f32 %v1961_v35, %v1960_v40 }
 0x34e   : > { %v1369_v55 = vpop.xlane.xlu1 %1368  ;;  %v1421_v57 = vmul.f32 0.6931472, %v2837_v18  ;;  %v4386_v56 = vpop.xlane.xlu0 %1686  ;;  %v1726_v11 = vsub.f32 %v1470_v31, %v4318_v50 }
 0x34f   : > { %v2839_v37 = vpop.eup %2838  ;;  %v1964_v20 = vadd.f32 %v1963_v13, %v1962_v34 }
 0x350   : > { %v1471_v25 = vadd.f32 %v1421_v57, %v4855_v28  ;;  %v2841_v3 = vpop.eup %2840  ;;  %v1423_v14 = vmul.f32 0.6931472, %v2839_v37  ;;  %v1921_v19 = vsel %vm4860_vm3, %v1726_v11, 0.0  ;;  %vm4874_vm3 = vmmov %vm4844_vm0 }
 0x351   : > { %v1425_v16 = vmul.f32 0.6931472, %v2841_v3  ;;  %v1965_v39 = vsel %vm4844_vm0, %v1921_v19, 0.0  ;;  %vm4876_vm0 = vnez %v4769_v29 }
 0x352   : > { %v1365_v6 = vpop.xlane.xlu1 %1364  ;;  %v1727_v53 = vsub.f32 %v1471_v25, %v4329_v47  ;;  %v4398_v44 = vpop.xlane.xlu0 %1688  ;;  %v1966_v26 = vadd.f32 %v1965_v39, %v1964_v20 }
 0x353   : > { %2844 = vlog2.f32 %v1365_v6  ;;  %v4862_v6 = vld [vmem:[#allocation43_spill] sm:$0xff] }
 0x354   : > { %2846 = vlog2.f32 %v1367_v8  ;;  %v4858_v8 = vld [vmem:[#allocation44_spill] sm:$0xff]  ;;  %v1922_v50 = vsel %vm4861_vm12, %v1727_v53, 0.0  ;;  %v1473_v0 = vadd.f32 %v1425_v16, %v4862_v6  ;;  %vm4875_vm12 = vnez %v4767_v62 }
 0x355   : > { %v2843_v5 = vpop.eup %2842  ;;  %2848 = vlog2.f32 %v1369_v55  ;;  %v1472_v27 = vadd.f32 %v1423_v14, %v4858_v8  ;;  %v1967_v57 = vsel %vm4863_vm7, %v1922_v50, 0.0  ;;  %vm4877_vm7 = vnez %v4773_v46  ;;  %v4881_v46 = vld [vmem:[#allocation11_spill] sm:$0xff] }
 0x356   : > { %v1375_v24 = vpop.xlane.xlu1 %1374  ;;  %v1427_v42 = vmul.f32 0.6931472, %v2843_v5  ;;  %v1691_v30 = vpop.xlane.xlu0 %1690  ;;  %v1729_v17 = vsub.f32 %v1473_v0, %v4352_v23  ;;  %v4867_v23 = vld [vmem:[#allocation47_spill] sm:$0xff] }
 0x357   : > { %v1728_v55 = vsub.f32 %v1472_v27, %v4338_v48  ;;  %v1968_v48 = vadd.f32 %v1967_v57, %v1966_v26 }
 0x358   : > { %v1474_v41 = vadd.f32 %v1427_v42, %v3800_v51 }
 0x359   : > { %v1923_v37 = vsel %vm4864_vm2, %v1728_v55, 0.0  ;;  %vm4878_vm2 = vmmov %vm4874_vm3 }
 0x35a   : > { %v1371_v58 = vpop.xlane.xlu1 %1370  ;;  %v1730_v51 = vsub.f32 %v1474_v41, %v4363_v45  ;;  %v1693_v31 = vpop.xlane.xlu0 %1692  ;;  %v1969_v28 = vsel %vm4865_vm6, %v1923_v37, 0.0  ;;  %vm4879_vm6 = vmmov %vm4878_vm2 }
 0x35b   : > { %2850 = vlog2.f32 %v1371_v58 }
 0x35c   : > { %v1925_v49 = vsel %vm4868_vm13, %v1730_v51, 0.0  ;;  %vm4882_vm13 = vnez %v4881_v46 }
 0x35d   : > { %v2845_v52 = vpop.eup %2844  ;;  %v1973_v22 = vsel %vm4871_vm4, %v1925_v49, 0.0 }
 0x35e   : > { %v1377_v18 = vpop.xlane.xlu1 %1376  ;;  %v1429_v47 = vmul.f32 0.6931472, %v2845_v52  ;;  %v2847_v59 = vpop.eup %2846 }
 0x35f   : > { %v1431_v4 = vmul.f32 0.6931472, %v2847_v59  ;;  %v2849_v43 = vpop.eup %2848  ;;  %v1695_v32 = vpop.xlane.xlu0 %1694 }
 0x360   : > { %v1475_v9 = vadd.f32 %v1429_v47, %v3822_v10  ;;  %v1924_v10 = vsel %vm4866_vm8, %v1729_v17, 0.0  ;;  %v1433_v3 = vmul.f32 0.6931472, %v2849_v43  ;;  %vm4880_vm8 = vmmov %vm4878_vm2 }
 0x361   : > { %v1476_v25 = vadd.f32 %v1431_v4, %v4867_v23  ;;  %v1971_v5 = vsel %vm4870_vm14, %v1924_v10, 0.0 }
 0x362   : > { %v1373_v63 = vpop.xlane.xlu1 %1372  ;;  %v1731_v33 = vsub.f32 %v1475_v9, %v4377_v38  ;;  %v1477_v34 = vadd.f32 %v1433_v3, %v3796_v61 }
 0x363   : > { %2852 = vlog2.f32 %v1373_v63  ;;  %v1732_v1 = vsub.f32 %v1476_v25, %v4386_v56  ;;  %v1697_v20 = vpop.xlane.xlu0 %1696 }
 0x364   : > { %2854 = vlog2.f32 %v1375_v24  ;;  %v1970_v24 = vadd.f32 %v1969_v28, %v1968_v48  ;;  %v1926_v38 = vsel %vm4869_vm11, %v1731_v33, 0.0  ;;  %v1733_v56 = vsub.f32 %v1477_v34, %v4398_v44  ;;  %v4883_v28 = vld [vmem:[#allocation49_spill] sm:$0xff]  ;;  %vm4884_vm11 = vmmov %vm4878_vm2  ;;  %v4889_v34 = vld [vmem:[#allocation51_spill] sm:$0xff] }
 0x365   : > { %v2851_v40 = vpop.eup %2850  ;;  %2856 = vlog2.f32 %v1377_v18  ;;  %v1975_v16 = vsel %vm4872_vm5, %v1926_v38, 0.0  ;;  %v1927_v42 = vsel %vm4873_vm9, %v1732_v1, 0.0  ;;  %v4887_v38 = vld [vmem:[#allocation19_spill] sm:$0xff]  ;;  %vm4890_vm5 = vmmov %vm4878_vm2 }
 0x366   : > { %v1383_v12 = vpop.xlane.xlu1 %1382  ;;  %v1435_v14 = vmul.f32 0.6931472, %v2851_v40  ;;  %v1972_v35 = vadd.f32 %v1971_v5, %v1970_v24  ;;  %v1977_v6 = vsel %vm4874_vm3, %v1927_v42, 0.0  ;;  %vm4888_vm4 = vnez %v4887_v38  ;;  %vm4891_vm9 = vmmov %vm4878_vm2 }
 0x367   : > { %v1699_v26 = vpop.xlane.xlu0 %1698 }
 0x368   : > { %v1478_v8 = vadd.f32 %v1435_v14, %v3881_v7  ;;  %v1974_v54 = vadd.f32 %v1973_v22, %v1972_v35 }
 0x36a   : > { %v1379_v45 = vpop.xlane.xlu1 %1378  ;;  %v1976_v18 = vadd.f32 %v1975_v16, %v1974_v54  ;;  %v1734_v19 = vsub.f32 %v1478_v8, %v1691_v30 }
 0x36b   : > { %2858 = vlog2.f32 %v1379_v45  ;;  %v1703_v23 = vpop.xlane.xlu0 %1702  ;;  %v4885_v45 = vld [vmem:[#allocation20_spill] sm:$0xff] }
 0x36c   : > { %2860 = vlog2.f32 %v1383_v12  ;;  %v1978_v0 = vadd.f32 %v1977_v6, %v1976_v18  ;;  %v1929_v44 = vsel %vm4876_vm0, %v1734_v19, 0.0  ;;  %vm4886_vm14 = vnez %v4885_v45  ;;  %v4894_v19 = vld [vmem:[#allocation52_spill] sm:$0xff]  ;;  %vm4899_vm0 = vmmov %vm4878_vm2 }
 0x36d   : > { %v2853_v58 = vpop.eup %2852  ;;  %v1981_v57 = vsel %vm4879_vm6, %v1929_v44, 0.0  ;;  %vm4906_vm6 = vmmov %vm4899_vm0 }
 0x36e   : > { %v1437_v11 = vmul.f32 0.6931472, %v2853_v58  ;;  %v1385_v53 = vpop.xlane.xlu1 %1384  ;;  %v2855_v52 = vpop.eup %2854 }
 0x36f   : > { %v1439_v13 = vmul.f32 0.6931472, %v2855_v52  ;;  %v2857_v50 = vpop.eup %2856 }
 0x370   : > { %v1479_v27 = vadd.f32 %v1437_v11, %v3923_v15  ;;  %v1928_v15 = vsel %vm4875_vm12, %v1733_v56, 0.0  ;;  %v1441_v55 = vmul.f32 0.6931472, %v2857_v50  ;;  %v4893_v56 = vld [vmem:[#allocation54_spill] sm:$0xff]  ;;  %vm4898_vm12 = vmmov %vm4878_vm2 }
 0x371   : > { %v1480_v21 = vadd.f32 %v1439_v13, %v3857_v2  ;;  %v1979_v39 = vsel %vm4878_vm2, %v1928_v15, 0.0  ;;  %vm4905_vm2 = vmmov %vm4899_vm0 }
 0x372   : > { %v1381_v61 = vpop.xlane.xlu1 %1380  ;;  %v1735_v7 = vsub.f32 %v1479_v27, %v1693_v31  ;;  %v1980_v2 = vadd.f32 %v1979_v39, %v1978_v0  ;;  %v1481_v17 = vadd.f32 %v1441_v55, %v3899_v60  ;;  %v4900_v39 = vld [vmem:[#allocation17_spill] sm:$0xff] }
 0x373   : > { %2862 = vlog2.f32 %v1381_v61  ;;  %v1736_v62 = vsub.f32 %v1480_v21, %v1695_v32 }
 0x374   : > { %2864 = vlog2.f32 %v1385_v53  ;;  %v1930_v63 = vsel %vm4877_vm7, %v1735_v7, 0.0  ;;  %v1982_v48 = vadd.f32 %v1981_v57, %v1980_v2  ;;  %v1737_v33 = vsub.f32 %v1481_v17, %v1697_v20  ;;  %v1707_v53 = vpop.xlane.xlu0 %1706  ;;  %v4895_v20 = vld [vmem:[#allocation18_spill] sm:$0xff] }
 0x375   : > { %v2859_v47 = vpop.eup %2858  ;;  %v1983_v4 = vsel %vm4880_vm8, %v1930_v63, 0.0  ;;  %v1931_v12 = vsel %vm4882_vm13, %v1736_v62, 0.0  ;;  %vm4896_vm3 = vnez %v4895_v20  ;;  %v4897_v7 = vld [vmem:[#allocation50_spill] sm:$0xff]  ;;  %vm4911_vm13 = vmmov %vm4899_vm0 }
 0x376   : > { %v1391_v59 = vpop.xlane.xlu1 %1390  ;;  %v1443_v41 = vmul.f32 0.6931472, %v2859_v47  ;;  %v2861_v30 = vpop.eup %2860  ;;  %v1984_v40 = vadd.f32 %v1983_v4, %v1982_v48  ;;  %v1985_v24 = vsel %vm4884_vm11, %v1931_v12, 0.0  ;;  %v1932_v14 = vsel %vm4886_vm14, %v1737_v33, 0.0  ;;  %vm4912_vm11 = vmmov %vm4899_vm0 }
 0x377   : > { %2866 = vlog2.f32 %v1391_v59  ;;  %v1447_v37 = vmul.f32 0.6931472, %v2861_v30  ;;  %v1987_v11 = vsel %vm4890_vm5, %v1932_v14, 0.0  ;;  %vm4914_vm14 = vmmov %vm4899_vm0 }
 0x378   : > { %v1482_v29 = vadd.f32 %v1443_v41, %v3963_v36  ;;  %v1986_v3 = vadd.f32 %v1985_v24, %v1984_v40  ;;  %v1711_v63 = vpop.xlane.xlu0 %1710  ;;  %v4907_v40 = vld [vmem:[#allocation53_spill] sm:$0xff] }
 0x379   : > { %v1484_v10 = vadd.f32 %v1447_v37, %v4883_v28 }
 0x37a   : > { %v1387_v9 = vpop.xlane.xlu1 %1386  ;;  %v1738_v31 = vsub.f32 %v1482_v29, %v1699_v26  ;;  %v1988_v54 = vadd.f32 %v1987_v11, %v1986_v3  ;;  %v4903_v29 = vld [vmem:[#allocation22_spill] sm:$0xff] }
 0x37b   : > { %2868 = vlog2.f32 %v1387_v9  ;;  %v1740_v5 = vsub.f32 %v1484_v10, %v1703_v23  ;;  %v4901_v9 = vld [vmem:[#allocation15_spill] sm:$0xff]  ;;  %vm4904_vm7 = vnez %v4903_v29  ;;  %v4909_v23 = vld [vmem:[#allocation25_spill] sm:$0xff] }
 0x37c   : > { %v1933_v58 = vsel %vm4888_vm4, %v1738_v31, 0.0  ;;  %vm4910_vm8 = vnez %v4909_v23 }
 0x37d   : > { %v2863_v51 = vpop.eup %2862  ;;  %v1989_v8 = vsel %vm4891_vm9, %v1933_v58, 0.0  ;;  %v1935_v18 = vsel %vm4238_vm10, %v1740_v5, 0.0  ;;  %vm4902_vm10 = vnez %v4901_v9 }
 0x37e   : > { %v1389_v43 = vpop.xlane.xlu1 %1388  ;;  %v2865_v60 = vpop.eup %2864  ;;  %v1445_v25 = vmul.f32 0.6931472, %v2863_v51  ;;  %v1990_v6 = vadd.f32 %v1989_v8, %v1988_v54  ;;  %v1993_v30 = vsel %vm4899_vm0, %v1935_v18, 0.0 }
 0x37f   : > { %2870 = vlog2.f32 %v1389_v43  ;;  %v1449_v35 = vmul.f32 0.6931472, %v2865_v60 }
 0x380   : > { %v1483_v32 = vadd.f32 %v1445_v25, %v4889_v34 }
 0x381   : > { %v2867_v36 = vpop.eup %2866  ;;  %v1485_v0 = vadd.f32 %v1449_v35, %v4897_v7 }
 0x382   : > { %v1393_v49 = vpop.xlane.xlu1 %1392  ;;  %v1455_v1 = vmul.f32 0.6931472, %v2867_v36 }
 0x383   : > { %2872 = vlog2.f32 %v1393_v49 }
 0x384   : > { %v1488_v50 = vadd.f32 %v1455_v1, %v4894_v19 }
 0x385   : > { %v2869_v22 = vpop.eup %2868 }
 0x386   : > { %v1451_v52 = vmul.f32 0.6931472, %v2869_v22  ;;  %v1701_v16 = vpop.xlane.xlu1 %1700  ;;  %v1744_v26 = vsub.f32 %v1488_v50, %v1711_v63 }
 0x387   : > { %v1739_v27 = vsub.f32 %v1483_v32, %v1701_v16 }
 0x388   : > { %v1486_v13 = vadd.f32 %v1451_v52, %v4893_v56  ;;  %v1939_v60 = vsel %vm4910_vm8, %v1744_v26, 0.0  ;;  %v4915_v56 = vld [vmem:[#allocation41_spill] sm:$0xff] }
 0x389   : > { %v2871_v61 = vpop.eup %2870  ;;  %v1934_v47 = vsel %vm4896_vm3, %v1739_v27, 0.0  ;;  %v2001_v3 = vsel %vm4912_vm11, %v1939_v60, 0.0 }
 0x38a   : > { %v1742_v15 = vsub.f32 %v1486_v13, %v1707_v53  ;;  %v1453_v21 = vmul.f32 0.6931472, %v2871_v61  ;;  %v1991_v59 = vsel %vm4898_vm12, %v1934_v47, 0.0  ;;  %v1705_v44 = vpop.xlane.xlu1 %1704  ;;  %v4916_v13 = vld [vmem:[#allocation8_spill] sm:$0xff] }
 0x38b   : > { %v1992_v55 = vadd.f32 %v1991_v59, %v1990_v6  ;;  %v1741_v41 = vsub.f32 %v1485_v0, %v1705_v44  ;;  %vm2151_vm4 = vcmp.eq.s32.totalorder %v4916_v13, 0 }
 0x38c   : > { %v1487_v57 = vadd.f32 %v1453_v21, %v4900_v39  ;;  %v1937_v4 = vsel %vm4904_vm7, %v1742_v15, 0.0 }
 0x38d   : > { %v2873_v62 = vpop.eup %2872  ;;  %v1936_v2 = vsel %vm4902_vm10, %v1741_v41, 0.0  ;;  %v1994_v17 = vadd.f32 %v1993_v30, %v1992_v55  ;;  %v1997_v43 = vsel %vm4906_vm6, %v1937_v4, 0.0 }
 0x38e   : > { %v1457_v37 = vmul.f32 0.6931472, %v2873_v62  ;;  %v1995_v48 = vsel %vm4905_vm2, %v1936_v2, 0.0  ;;  %v1709_v51 = vpop.xlane.xlu1 %1708 }
 0x38f   : > { %v1996_v46 = vadd.f32 %v1995_v48, %v1994_v17  ;;  %v1743_v12 = vsub.f32 %v1487_v57, %v1709_v51 }
 0x390   : > { %v1489_v33 = vadd.f32 %v1457_v37, %v4907_v40 }
 0x391   : > { %v1938_v28 = vsel %vm4295_vm1, %v1743_v12, 0.0  ;;  %v1998_v10 = vadd.f32 %v1997_v43, %v1996_v46  ;;  %vm2150_vm1 = vcmp.eq.s32.totalorder %v4915_v56, 0 }
 0x392   : > { %v1999_v25 = vsel %vm4911_vm13, %v1938_v28, 0.0  ;;  %v1713_v36 = vpop.xlane.xlu1 %1712  ;;  %vm2152_vm9 = vmand %vm2150_vm1, %vm2151_vm4 }
 0x393   : > { %v2000_v24 = vadd.f32 %v1999_v25, %v1998_v10  ;;  %v1745_v49 = vsub.f32 %v1489_v33, %v1713_v36 }
 0x395   : > { %v1940_v14 = vsel %vm4306_vm15, %v1745_v49, 0.0  ;;  %v2002_v38 = vadd.f32 %v2001_v3, %v2000_v24  ;;  %vm2153_vm15 = vcmp.eq.s32.totalorder %v4916_v13, 1 }
 0x396   : > { %v2003_v58 = vsel %vm4914_vm14, %v1940_v14, 0.0  ;;  %vm2154_vm5 = vmand %vm2150_vm1, %vm2153_vm15 }
 0x397   : > { %v2004_v5 = vadd.f32 %v2003_v58, %v2002_v38 }
 0x399   : > { %2005 = vadd.xlane.f32.xlu0 %v2004_v5 }
 0x39e   : > { %v2142_v22 = vpop.xlane.xlu1 %2141 }
 0x39f   : > { %v2143_v35 = vrot.slane %v2142_v22, 4 }
 0x3a1   : > { %v2144_v1 = vadd.f32 %v2143_v35, %v2142_v22 }
 0x3a3   : > { %v2145_v34 = vrot.slane %v2144_v1, 2 }
 0x3a5   : > { %v2146_v52 = vadd.f32 %v2145_v34, %v2144_v1 }
 0x3a7   : > { %v2147_v54 = vrot.slane %v2146_v52, 1 }
 0x3a9   : > { %v2148_v18 = vadd.f32 %v2147_v54, %v2146_v52 }
 0x426   : > { %v2006_v32 = vpop.xlane.xlu0 %2005 }
 0x427   : > { %v2007_v11 = vrot.slane %v2006_v32, 4 }
 0x429   : > { %v2008_v53 = vadd.f32 %v2007_v11, %v2006_v32 }
 0x42b   : > { %v2009_v16 = vrot.slane %v2008_v53, 2 }
 0x42d   : > { %v2010_v8 = vadd.f32 %v2009_v16, %v2008_v53 }
 0x42f   : > { %v2011_v27 = vrot.slane %v2010_v8, 1 }
 0x431   : > { %v2012_v42 = vadd.f32 %v2011_v27, %v2010_v8 }
 0x433   : > { %2684 = vpush %v2012_v42 }
 0x434   : > { %2686 = vpush %v2148_v18 }
 0x463   : > { %2172 = sbr.rel (!%p3086_p5) target bundleno = 1158 (0x486), region = 48 }
 0x464   : > { %s2685_s9 = spop %2684 }
 0x465   : > { %v2157_v61 = vstv %s2685_s9  ;;  %s2687_s13 = spop %2686 }
 0x466   : > { %v2155_v19 = vstv %s2687_s13 }
 0x467   : > { %v2156_v50 = vsel %vm2154_vm5, %v2155_v19, 0.0 }
 0x468   : > { %v2158_v20 = vsel %vm2152_vm9, %v2157_v61, %v2156_v50 }
 0x469   : > { %2159 = vst [vmem:[%s4489_s14] sm:$0xff] %v2158_v20 }
 0x46a   : > { %s4923_s21 = smov (!%p2175_p11, %s2174_s21), 32 }
 0x46b   : > { %s4497_s17 = sshll.u32 %s4923_s21, 6 }
 0x46c   : > { %s2179_s19 = ssub.s32 2048, %s4497_s17 }
 0x46d   : > { %2180 = vsyncadd %s2161_s16, %s2179_s19  ;;  %p2410_p12 = scmp.ne.s32.totalorder %s4497_s17, 0  ;;  %s2449_s20 = sshll.u32 %s3069_s28, 11 }
 0x46e   : > { %s4507_s9 = scalar_lea.hbm %s4580_s6, %s2449_s20  ;;  %s2185_s15 = sshll.u32 %s3285_s22, 4  ;;  %s4510_s15 = int_to_ptr.vmem [resolvable:$true] %s2185_s15 }
 0x46f   : > { %s2906_s13 = scalar_lea.vmem %s4510_s15, %s4497_s17  ;;  %s3004_s21 = smov [#allocation2]  }
 0x470   : > { %p2907_p13 = scmp.ne.s32.totalorder %s4510_s15, %s2906_s13  ;;  %s2910_s19 = sshll.u32 %s3004_s21, 4  ;;  %s2911_s19 = int_to_ptr.vmem [resolvable:$false] %s2910_s19 }
 0x471   : > { %s2912_s18 = scalar_lea.vmem %s2911_s19, 4096  ;;  %p2913_p2 = scmp.lt.s32.totalorder %s4510_s15, %s2911_s19 }
 0x472   : > { %p2908_p0 = pnand %p2907_p13, %p2410_p12  ;;  %p2914_p3 = scmp.lt.s32.totalorder %s2912_s18, %s2906_s13 }
 0x474   : > { %p2909_p1 = pneg %p2908_p0  ;;  %p2915_p4 = por %p2914_p3, %p2913_p2 }
 0x476   : > { %p2916_p7 = pnand %p2915_p4, %p2909_p1 }
 0x478   : > { %2919 = shalt.err (!%p2916_p7)
}
 0x479   : > { %s2920_s22 = scalar_lea.hbm %s4507_s9, %s4497_s17  ;;  %s2924_s8 = scalar_lea.hbm %s4580_s6, 8000 }
 0x47a   : > { %p2921_p8 = scmp.ne.s32.totalorder %s4507_s9, %s2920_s22  ;;  %p2925_p11 = scmp.lt.u32.totalorder %s4507_s9, %s4580_s6 }
 0x47b   : > { %p2926_p13 = scmp.lt.u32.totalorder %s2924_s8, %s2920_s22  ;;  %p2928_p1 = scmp.lt.u32.totalorder %s2920_s22, %s4507_s9 }
 0x47c   : > { %p2922_p9 = pnand %p2921_p8, %p2410_p12 }
 0x47d   : > { %p2927_p0 = por %p2926_p13, %p2925_p11 }
 0x47e   : > { %p2923_p10 = pneg %p2922_p9 }
 0x47f   : > { %p2929_p2 = por %p2928_p1, %p2927_p0 }
 0x481   : > { %p2930_p3 = pnand %p2929_p2, %p2923_p10 }
 0x483   : > { %2933 = shalt.err (!%p2930_p3)
}
 0x484   : > { %s3005_s13 = smov 64   ;;  %s3006_s19 = smov 4  }
 0x485   : > { %2191 = dma.vmem_to_hbm [thread:$0]  (%p2410_p12), %s4510_s15, %s4497_s17, %s4507_s9, %s2161_s16, %s3005_s13, %s3005_s13, %s3006_s19  }
 0x486 PF: > { %s2414_s20 = sshll.u32 %s3069_s28, 7  ;;  %s2201_s23 = sshll.u32 %s4489_s14, 4  ;;  %s2202_s23 = int_to_ptr.vmem [resolvable:$true] %s2201_s23 }
 0x487   : > { %s2199_s21 = scalar_lea.hbm %s4581_s7, %s2414_s20  ;;  %s2934_s18 = scalar_lea.vmem %s2202_s23, 128 }
 0x488   : > { %p2935_p4 = scmp.ne.s32.totalorder %s2202_s23, %s2934_s18  ;;  %s3007_s0 = smov [#allocation4]  }
 0x489   : > { %s2938_s1 = sshll.u32 %s3007_s0, 4  ;;  %s2939_s1 = int_to_ptr.vmem [resolvable:$false] %s2938_s1 }
 0x48a   : > { %p2936_p7 = pnand %p2935_p4, %p3086_p5  ;;  %s2940_s16 = scalar_lea.vmem %s2939_s1, 256 }
 0x48b   : > { %p2941_p12 = scmp.lt.s32.totalorder %s2202_s23, %s2939_s1  ;;  %p2942_p9 = scmp.lt.s32.totalorder %s2940_s16, %s2934_s18 }
 0x48c   : > { %p2937_p8 = pneg %p2936_p7 }
 0x48d   : > { %p2943_p10 = por %p2942_p9, %p2941_p12 }
 0x48f   : > { %p2944_p11 = pnand %p2943_p10, %p2937_p8 }
 0x491   : > { %2947 = shalt.err (!%p2944_p11)
}
 0x492   : > { %s2948_s28 = scalar_lea.hbm %s2199_s21, 128  ;;  %s2952_s9 = scalar_lea.hbm %s4581_s7, 512 }
 0x493   : > { %p2949_p13 = scmp.ne.s32.totalorder %s2199_s21, %s2948_s28  ;;  %p2953_p2 = scmp.lt.u32.totalorder %s2199_s21, %s4581_s7 }
 0x494   : > { %p2954_p3 = scmp.lt.u32.totalorder %s2952_s9, %s2948_s28  ;;  %p2956_p7 = scmp.lt.u32.totalorder %s2948_s28, %s2199_s21 }
 0x495   : > { %p2950_p0 = pnand %p2949_p13, %p3086_p5 }
 0x496   : > { %p2955_p4 = por %p2954_p3, %p2953_p2 }
 0x497   : > { %p2951_p1 = pneg %p2950_p0 }
 0x498   : > { %p2957_p12 = por %p2956_p7, %p2955_p4 }
 0x49a   : > { %p2958_p8 = pnand %p2957_p12, %p2951_p1 }
 0x49c   : > { %2961 = shalt.err (!%p2958_p8)
}
 0x49d   : > { %s4917_s0 = scalar_lea.sflag [#allocation5], %s3263_s29 }
 0x49e   : > { %2688 = dma.vmem_to_hbm [thread:$0]  (%p3086_p5), %s2202_s23, 128, %s2199_s21, %s4917_s0  }
 0x49f PF: > { %p2698_p9 = scmp.ge.s32.totalorder %s3000_s27, 2  ;;  %s2213_s1 = sand.u32 1, %s2988_s24  }
 0x4a0   : > { %s2214_s19 = scalar_lea.sflag [#allocation3], %s2213_s1 }
 0x4a1   : > { %p2692_p10 = pnand %p2698_p9, %p3090_p6 }
 0x4a3   : > { %2979 = dma.done.wait (!%p2692_p10), %s2214_s19, 2048  }
 0x4a4   : > { %2981 = vsyncadd (!%p2692_p10), %s2214_s19, 4294965248  ;;  %s2223_s20 = scalar_lea.sflag [#allocation5], %s2213_s1 }
 0x4a5   : > { %2983 = dma.done.wait (!%p2692_p10), %s2223_s20, 128  }
 0x4a6   : > { %2985 = vsyncadd (!%p2692_p10), %s2223_s20, 4294967168  ;;  %p21_p5 = scmp.ge.s32.totalorder %s3073_s30, 6   ;;  %s4918_s24 = smov %s2992_s25 }
 0x4a7   : > { %s4919_s25 = smov %s2996_s26  ;;  %s4920_s26 = smov %s3084_s10 }
 0x4a8   : > { %s4921_s27 = smov %s3073_s30  ;;  %23 = sbr.rel (!%p21_p5) target bundleno = 8 (0x8), region = 99 }
 0x4af   :  { %2228 = vsyncpa [#allocation3], 1 }
 0x4b0   :  { %2230 = vsyncpa [#allocation3 + $0x1], 1 }
 0x4b1   :  { %2231 = vsyncpa [#allocation5], 1 }
 0x4b2   :  { %2233 = vsyncpa [#allocation5 + $0x1], 1 }

</bundles_post_ra>
